<compile_context>
chip_gen: v6e
topology: v6e:2x2x1
jax: 0.10.0
libtpu: 0.0.40
codegen_flags: <defaults>
</compile_context>

<pallas_src>
import math

import jax
import jax.numpy as jnp
from jax.experimental import pallas as pl
from jax.experimental.pallas import tpu as pltpu

# ----------------------------- configuration -------------------------------
B = 2              # batch
S = 8              # sequence length
H = 32             # hidden size (stand-in for BERT's 768)
NH = 2             # attention heads
HD = H // NH       # head dim
FFN = 64           # intermediate size
NUM_LAYERS = 2     # synthetic BERT depth
VOCAB = 100
LINEAR_SIZE = 16   # classifier `linear_size`
LN_EPS = 1e-12
BN_EPS = 1e-5
M = B * S          # flattened token count
HEAD_W = 128       # lane-dense padded width for the classifier head


# ------------------------------ shared helpers ------------------------------
def _layer_norm(x, g, b):
    mu = jnp.mean(x, axis=-1, keepdims=True)
    var = jnp.mean((x - mu) ** 2, axis=-1, keepdims=True)
    return (x - mu) * jax.lax.rsqrt(var + LN_EPS) * g + b


def _gelu(x):
    # TODO(synk): tanh-approximate GELU (exact erf GELU differs at ~1e-3 level).
    c = math.sqrt(2.0 / math.pi)
    return 0.5 * x * (1.0 + jnp.tanh(c * (x + 0.044715 * x * x * x)))


# --------------------------- fused BERT + head kernel ------------------------
def fused_bert_kernel(x0_ref, mask_ref,
                      wqkv_ref, bqkv_ref, wo_ref,
                      wfi_ref, wfo_ref, vech_ref, bi_ref,
                      wp_ref, wbig_ref, hvec_ref,
                      out_ref):
    x = x0_ref[...]                       # [M, H] f32 residual stream
    mask = mask_ref[...]                  # [B, 1, S] additive (-1e9 on padded keys)
    scale = 1.0 / math.sqrt(HD)

    # ---- encoder layers: static in-kernel loop, all params VMEM resident ----
    for l in range(NUM_LAYERS):
        wqkv = wqkv_ref[l]                # [H, 3H]  bf16  (Wq | Wk | Wv)
        bqkv = bqkv_ref[l]                # [1, 3H]  f32
        wo = wo_ref[l]                    # [H, H]   bf16
        wfi = wfi_ref[l]                  # [H, FFN] bf16
        wfo = wfo_ref[l]                  # [FFN, H] bf16
        vech = vech_ref[l]                # [6, H]   f32: bo, bf, ln1g, ln1b, ln2g, ln2b
        bi = bi_ref[l]                    # [1, FFN] f32

        # Fused QKV projection: one MXU dot instead of 6 narrow per-head dots.
        xb = x.astype(jnp.bfloat16)
        qkv = jnp.dot(xb, wqkv, preferred_element_type=jnp.float32) + bqkv   # [M, 3H]

        ctxs = []
        for h in range(NH):
            qh = qkv[:, h * HD:(h + 1) * HD].reshape(B, S, HD).astype(jnp.bfloat16)
            kh = qkv[:, H + h * HD:H + (h + 1) * HD].reshape(B, S, HD).astype(jnp.bfloat16)
            vh = qkv[:, 2 * H + h * HD:2 * H + (h + 1) * HD].reshape(B, S, HD).astype(jnp.bfloat16)
            s = jnp.einsum('bqd,bkd->bqk', qh, kh,
                           preferred_element_type=jnp.float32) * scale + mask
            m = jnp.max(s, axis=-1, keepdims=True)
            e = jnp.exp(s - m)
            p = e * pl.reciprocal(jnp.sum(e, axis=-1, keepdims=True), approx=True)
            ctx = jnp.einsum('bqk,bkd->bqd', p.astype(jnp.bfloat16), vh,
                             preferred_element_type=jnp.float32)             # [B, S, HD]
            ctxs.append(ctx.reshape(M, HD))

        # Fused output projection: one [M,H] x [H,H] dot on the all-heads context.
        ctx_full = jnp.concatenate(ctxs, axis=-1).astype(jnp.bfloat16)       # [M, H]
        attn = jnp.dot(ctx_full, wo, preferred_element_type=jnp.float32) + vech[0:1, :]

        x1 = _layer_norm(x + attn, vech[2:3, :], vech[3:4, :])               # LN1 (f32)
        hmid = _gelu(jnp.dot(x1.astype(jnp.bfloat16), wfi,
                             preferred_element_type=jnp.float32) + bi)
        ffn = jnp.dot(hmid.astype(jnp.bfloat16), wfo,
                      preferred_element_type=jnp.float32) + vech[1:2, :]
        x = _layer_norm(x1 + ffn, vech[4:5, :], vech[5:6, :])                # LN2 (f32)

    # ---- pooler + classifier head (BN folded into linears; eval dropout=id) ----
    # Computed lane/sublane-dense on ALL token rows; the wrapper picks the CLS
    # rows and column 0 (free XLA slicing), so no in-kernel gather is needed.
    hvec = hvec_ref[...]                  # [3, 128] f32: bp, b1', b2' (padded)
    pooled = jnp.tanh(jnp.dot(x.astype(jnp.bfloat16), wp_ref[...],
                              preferred_element_type=jnp.float32) + hvec[0:1, :])
    z = jnp.dot(pooled.astype(jnp.bfloat16), wbig_ref[0],
                preferred_element_type=jnp.float32) + hvec[1:2, :]           # linear1 ∘ BN1
    z = jnp.dot(z.astype(jnp.bfloat16), wbig_ref[1],
                preferred_element_type=jnp.float32) + hvec[2:3, :]           # linear2 ∘ BN2
    out_ref[...] = 1.0 / (1.0 + jnp.exp(-z))                                 # exact sigmoid


# ------------------------------ pallas wrapper -------------------------------
def bert_classifier_fused(x0, mask_bias, packed):
    c2 = lambda i: (0, 0)
    c3 = lambda i: (0, 0, 0)
    in_specs = [
        pl.BlockSpec((M, H), c2),                        # x0 (flat [B*S, H] slab)
        pl.BlockSpec((B, 1, S), c3),                     # attention mask bias
        pl.BlockSpec((NUM_LAYERS, H, 3 * H), c3),        # fused QKV weights (bf16)
        pl.BlockSpec((NUM_LAYERS, 1, 3 * H), c3),        # fused QKV bias row
        pl.BlockSpec((NUM_LAYERS, H, H), c3),            # output projection (bf16)
        pl.BlockSpec((NUM_LAYERS, H, FFN), c3),          # FFN in (bf16)
        pl.BlockSpec((NUM_LAYERS, FFN, H), c3),          # FFN out (bf16)
        pl.BlockSpec((NUM_LAYERS, 6, H), c3),            # bo, bf, ln1g, ln1b, ln2g, ln2b
        pl.BlockSpec((NUM_LAYERS, 1, FFN), c3),          # FFN bias
        pl.BlockSpec((H, HEAD_W), c2),                   # pooler weight (padded, bf16)
        pl.BlockSpec((2, HEAD_W, HEAD_W), c3),           # BN-folded linear1/linear2 (bf16)
        pl.BlockSpec((3, HEAD_W), c2),                   # bp, b1', b2' (padded)
    ]
    out_specs = pl.BlockSpec((M, HEAD_W), c2)            # lane-dense output slab
    return pl.pallas_call(
        fused_bert_kernel,
        out_shape=jax.ShapeDtypeStruct((M, HEAD_W), jnp.float32),
        grid_spec=pltpu.PrefetchScalarGridSpec(
            num_scalar_prefetch=0,
            grid=(1,),
            in_specs=in_specs,
            out_specs=out_specs,
        ),
        compiler_params=pltpu.CompilerParams(
            dimension_semantics=("arbitrary",)),
    )(x0, mask_bias,
      packed['wqkv'], packed['bqkv'], packed['wo'],
      packed['wfi'], packed['wfo'], packed['vech'], packed['bi'],
      packed['wp'], packed['wbig'], packed['hvec'])


# ------------------------------ parameter setup ------------------------------
def init_params(key):
    keys = iter(jax.random.split(key, 64))
    w = lambda shp: (0.02 * jax.random.normal(next(keys), shp)).astype(jnp.float32)
    zeros = lambda shp: jnp.zeros(shp, jnp.float32)
    ones = lambda shp: jnp.ones(shp, jnp.float32)

    emb = {'word': w((VOCAB, H)), 'pos': w((S, H)), 'type': w((1, H)),
           'lng': ones((1, 1, H)), 'lnb': zeros((1, 1, H))}
    layers = []
    for _ in range(NUM_LAYERS):
        layers.append({
            'wq': w((H, H)), 'bq': w((H,)),
            'wk': w((H, H)), 'bk': w((H,)),
            'wv': w((H, H)), 'bv': w((H,)),
            'wo': w((H, H)), 'bo': w((H,)),
            'ln1g': ones((H,)), 'ln1b': zeros((H,)),
            'wi': w((H, FFN)), 'bi': w((FFN,)),
            'wf': w((FFN, H)), 'bf': w((H,)),
            'ln2g': ones((H,)), 'ln2b': zeros((H,)),
        })
    head = {'wp': w((H, H)), 'bp': w((H,)),                         # pooler
            'w1': w((H, LINEAR_SIZE)), 'b1': w((LINEAR_SIZE,)),     # linear1
            'bn1g': ones((LINEAR_SIZE,)), 'bn1b': zeros((LINEAR_SIZE,)),
            'bn1m': zeros((LINEAR_SIZE,)), 'bn1v': ones((LINEAR_SIZE,)),
            'w2': w((LINEAR_SIZE, 1)), 'b2': w((1,)),               # linear2
            'bn2g': ones((1,)), 'bn2b': zeros((1,)),
            'bn2m': zeros((1,)), 'bn2v': ones((1,))}
    return emb, layers, head


def pack_params(layers, head):
    """Pack parameters into a few stacked, kernel-friendly bf16/f32 slabs."""
    # TODO(synk): real PyTorch nn.Linear weights are [out, in]; transpose them
    # here before packing if pretrained bert-base-cased weights are loaded.
    wqkv, bqkv, wo, wfi, wfo, vech, bi = [], [], [], [], [], [], []
    for lp in layers:
        wqkv.append(jnp.concatenate([lp['wq'], lp['wk'], lp['wv']],
                                    axis=1).astype(jnp.bfloat16))             # [H, 3H]
        bqkv.append(jnp.concatenate([lp['bq'], lp['bk'], lp['bv']]).reshape(1, 3 * H))
        wo.append(lp['wo'].astype(jnp.bfloat16))
        wfi.append(lp['wi'].astype(jnp.bfloat16))
        wfo.append(lp['wf'].astype(jnp.bfloat16))
        vech.append(jnp.stack([lp['bo'], lp['bf'], lp['ln1g'], lp['ln1b'],
                               lp['ln2g'], lp['ln2b']], axis=0))              # [6, H]
        bi.append(lp['bi'].reshape(1, FFN))

    packed = {'wqkv': jnp.stack(wqkv), 'bqkv': jnp.stack(bqkv),
              'wo': jnp.stack(wo), 'wfi': jnp.stack(wfi),
              'wfo': jnp.stack(wfo), 'vech': jnp.stack(vech),
              'bi': jnp.stack(bi)}

    # Fold eval-mode BatchNorm1d into linear1 / linear2 (free wrapper precompute).
    s1 = head['bn1g'] * jax.lax.rsqrt(head['bn1v'] + BN_EPS)
    w1f = head['w1'] * s1[None, :]
    b1f = (head['b1'] - head['bn1m']) * s1 + head['bn1b']
    s2 = head['bn2g'] * jax.lax.rsqrt(head['bn2v'] + BN_EPS)
    w2f = head['w2'] * s2[None, :]
    b2f = (head['b2'] - head['bn2m']) * s2 + head['bn2b']

    # Zero-pad the head to a lane-dense width of 128 (wrapper-side, free).
    wp = jnp.zeros((H, HEAD_W), jnp.bfloat16).at[:, :H].set(head['wp'].astype(jnp.bfloat16))
    w1p = jnp.zeros((HEAD_W, HEAD_W), jnp.bfloat16).at[:H, :LINEAR_SIZE].set(w1f.astype(jnp.bfloat16))
    w2p = jnp.zeros((HEAD_W, HEAD_W), jnp.bfloat16).at[:LINEAR_SIZE, :1].set(w2f.astype(jnp.bfloat16))

    def pad_row(v):
        return jnp.zeros((HEAD_W,), jnp.float32).at[:v.shape[0]].set(v)

    hvec = jnp.stack([pad_row(head['bp']),   # 0 pooler bias
                      pad_row(b1f),          # 1 BN-folded linear1 bias
                      pad_row(b2f)],         # 2 BN-folded linear2 bias
                     axis=0)
    packed.update({'wp': wp, 'wbig': jnp.stack([w1p, w2p]), 'hvec': hvec})
    return packed


# -------------------------------- full forward -------------------------------
@jax.jit
def forward(tokens, attention_mask, emb, packed):
    # Glue: embedding gather + embedding layer-norm (tiny, gather-heavy) in XLA.
    x = (jnp.take(emb['word'], tokens, axis=0)
         + emb['pos'][None, :, :] + emb['type'][None, :, :])          # [B, S, H]
    x = _layer_norm(x, emb['lng'], emb['lnb']).astype(jnp.float32)
    x0 = x.reshape(M, H)                                              # flat [B*S, H] slab

    mask_bias = ((1.0 - attention_mask.astype(jnp.float32)) * -1e9)[:, None, :]  # [B,1,S]

    out128 = bert_classifier_fused(x0, mask_bias, packed)             # [M, 128]
    # CLS rows (token 0 of each sequence), column 0 = sigmoid probability.
    return out128.reshape(B, S, HEAD_W)[:, 0, :1]                     # [B, 1]


# ----------------------------------- main ------------------------------------
if __name__ == "__main__":
    key = jax.random.PRNGKey(0)
    k_par, k_tok = jax.random.split(key)

    # TODO(synk): pretrained `bert-base-cased` weights are not loadable here;
    # a deterministically-initialized 2-layer synthetic BERT encoder is used.
    emb, layers, head = init_params(k_par)
    packed = pack_params(layers, head)

    tokens = jax.random.randint(k_tok, (B, S), 0, VOCAB, dtype=jnp.int32)
    lengths = jnp.array([S, 5], dtype=jnp.int32)
    attention_mask = (jnp.arange(S)[None, :] < lengths[:, None]).astype(jnp.int32)

    out = forward(tokens, attention_mask, emb, packed)
    out = jax.block_until_ready(out)
    assert out.shape == (B, 1) and bool(jnp.all(jnp.isfinite(out)))
    assert bool(jnp.all((out >= 0.0) & (out <= 1.0)))
    print("KERNEL_OK")
</pallas_src>

<mosaic_0001>
module attributes {stable_mosaic.version = 11 : i64} {
  func.func @fused_bert_kernel(%arg0: i32, %arg1: memref<16x32xf32, #tpu.memory_space<vmem>>, %arg2: memref<2x1x8xf32, #tpu.memory_space<vmem>>, %arg3: memref<2x32x96xbf16, #tpu.memory_space<vmem>>, %arg4: memref<2x1x96xf32, #tpu.memory_space<vmem>>, %arg5: memref<2x32x32xbf16, #tpu.memory_space<vmem>>, %arg6: memref<2x32x64xbf16, #tpu.memory_space<vmem>>, %arg7: memref<2x64x32xbf16, #tpu.memory_space<vmem>>, %arg8: memref<2x6x32xf32, #tpu.memory_space<vmem>>, %arg9: memref<2x1x64xf32, #tpu.memory_space<vmem>>, %arg10: memref<32x128xbf16, #tpu.memory_space<vmem>>, %arg11: memref<2x128x128xbf16, #tpu.memory_space<vmem>>, %arg12: memref<3x128xf32, #tpu.memory_space<vmem>>, %arg13: memref<16x128xf32, #tpu.memory_space<vmem>>) attributes {dimension_semantics = [#tpu.dimension_semantics<arbitrary>], iteration_bounds = array<i64: 1>, scalar_prefetch = 0 : i64, scratch_operands = 0 : i64, tpu.core_type = #tpu.core_type<tc>, window_params = [{pipeline_mode = #tpu.pipeline_mode<synchronous>, transform_indices = @transform_0, window_bounds = array<i64: 16, 32>}, {pipeline_mode = #tpu.pipeline_mode<synchronous>, transform_indices = @transform_1, window_bounds = array<i64: 2, 1, 8>}, {pipeline_mode = #tpu.pipeline_mode<synchronous>, transform_indices = @transform_2, window_bounds = array<i64: 2, 32, 96>}, {pipeline_mode = #tpu.pipeline_mode<synchronous>, transform_indices = @transform_3, window_bounds = array<i64: 2, 1, 96>}, {pipeline_mode = #tpu.pipeline_mode<synchronous>, transform_indices = @transform_4, window_bounds = array<i64: 2, 32, 32>}, {pipeline_mode = #tpu.pipeline_mode<synchronous>, transform_indices = @transform_5, window_bounds = array<i64: 2, 32, 64>}, {pipeline_mode = #tpu.pipeline_mode<synchronous>, transform_indices = @transform_6, window_bounds = array<i64: 2, 64, 32>}, {pipeline_mode = #tpu.pipeline_mode<synchronous>, transform_indices = @transform_7, window_bounds = array<i64: 2, 6, 32>}, {pipeline_mode = #tpu.pipeline_mode<synchronous>, transform_indices = @transform_8, window_bounds = array<i64: 2, 1, 64>}, {pipeline_mode = #tpu.pipeline_mode<synchronous>, transform_indices = @transform_9, window_bounds = array<i64: 32, 128>}, {pipeline_mode = #tpu.pipeline_mode<synchronous>, transform_indices = @transform_10, window_bounds = array<i64: 2, 128, 128>}, {pipeline_mode = #tpu.pipeline_mode<synchronous>, transform_indices = @transform_11, window_bounds = array<i64: 3, 128>}, {pipeline_mode = #tpu.pipeline_mode<synchronous>, transform_indices = @transform_12, window_bounds = array<i64: 16, 128>}]} {
    %c0 = arith.constant 0 : index
    %c0_0 = arith.constant 0 : index
    %0 = vector.load %arg1[%c0, %c0_0] : memref<16x32xf32, #tpu.memory_space<vmem>>, vector<16x32xf32>
    %c0_1 = arith.constant 0 : index
    %c0_2 = arith.constant 0 : index
    %c0_3 = arith.constant 0 : index
    %1 = vector.load %arg2[%c0_1, %c0_2, %c0_3] : memref<2x1x8xf32, #tpu.memory_space<vmem>>, vector<2x1x8xf32>
    %c0_4 = arith.constant 0 : index
    %c0_5 = arith.constant 0 : index
    %c0_6 = arith.constant 0 : index
    %2 = vector.load %arg3[%c0_4, %c0_5, %c0_6] : memref<2x32x96xbf16, #tpu.memory_space<vmem>>, vector<1x32x96xbf16>
    %3 = vector.shape_cast %2 : vector<1x32x96xbf16> to vector<32x96xbf16>
    %c0_7 = arith.constant 0 : index
    %c0_8 = arith.constant 0 : index
    %c0_9 = arith.constant 0 : index
    %4 = vector.load %arg4[%c0_7, %c0_8, %c0_9] : memref<2x1x96xf32, #tpu.memory_space<vmem>>, vector<1x1x96xf32>
    %5 = vector.shape_cast %4 : vector<1x1x96xf32> to vector<1x96xf32>
    %c0_10 = arith.constant 0 : index
    %c0_11 = arith.constant 0 : index
    %c0_12 = arith.constant 0 : index
    %6 = vector.load %arg5[%c0_10, %c0_11, %c0_12] : memref<2x32x32xbf16, #tpu.memory_space<vmem>>, vector<1x32x32xbf16>
    %7 = vector.shape_cast %6 : vector<1x32x32xbf16> to vector<32x32xbf16>
    %c0_13 = arith.constant 0 : index
    %c0_14 = arith.constant 0 : index
    %c0_15 = arith.constant 0 : index
    %8 = vector.load %arg6[%c0_13, %c0_14, %c0_15] : memref<2x32x64xbf16, #tpu.memory_space<vmem>>, vector<1x32x64xbf16>
    %9 = vector.shape_cast %8 : vector<1x32x64xbf16> to vector<32x64xbf16>
    %c0_16 = arith.constant 0 : index
    %c0_17 = arith.constant 0 : index
    %c0_18 = arith.constant 0 : index
    %10 = vector.load %arg7[%c0_16, %c0_17, %c0_18] : memref<2x64x32xbf16, #tpu.memory_space<vmem>>, vector<1x64x32xbf16>
    %11 = vector.shape_cast %10 : vector<1x64x32xbf16> to vector<64x32xbf16>
    %c0_19 = arith.constant 0 : index
    %c0_20 = arith.constant 0 : index
    %c0_21 = arith.constant 0 : index
    %12 = vector.load %arg8[%c0_19, %c0_20, %c0_21] : memref<2x6x32xf32, #tpu.memory_space<vmem>>, vector<1x6x32xf32>
    %13 = vector.shape_cast %12 : vector<1x6x32xf32> to vector<6x32xf32>
    %c0_22 = arith.constant 0 : index
    %c0_23 = arith.constant 0 : index
    %c0_24 = arith.constant 0 : index
    %14 = vector.load %arg9[%c0_22, %c0_23, %c0_24] : memref<2x1x64xf32, #tpu.memory_space<vmem>>, vector<1x1x64xf32>
    %15 = vector.shape_cast %14 : vector<1x1x64xf32> to vector<1x64xf32>
    %16 = arith.truncf %0 : vector<16x32xf32> to vector<16x32xbf16>
    %cst = arith.constant dense<0.000000e+00> : vector<16x96xf32>
    %17 = tpu.matmul %16, %3, %cst {dimension_numbers = #tpu.dot_dimension_numbers<[1], [0], [0], [1], [0, 0, 1, 1], [], []>} : vector<16x32xbf16>, vector<32x96xbf16>, vector<16x96xf32> -> vector<16x96xf32>
    %18 = vector.broadcast %5 : vector<1x96xf32> to vector<16x96xf32>
    %19 = arith.addf %17, %18 : vector<16x96xf32>
    %20 = vector.extract_strided_slice %19 {offsets = [0, 0], sizes = [16, 16], strides = [1, 1]} : vector<16x96xf32> to vector<16x16xf32>
    %21 = vector.shape_cast %20 : vector<16x16xf32> to vector<2x8x16xf32>
    %22 = arith.truncf %21 : vector<2x8x16xf32> to vector<2x8x16xbf16>
    %23 = vector.extract_strided_slice %19 {offsets = [0, 32], sizes = [16, 16], strides = [1, 1]} : vector<16x96xf32> to vector<16x16xf32>
    %24 = vector.shape_cast %23 : vector<16x16xf32> to vector<2x8x16xf32>
    %25 = arith.truncf %24 : vector<2x8x16xf32> to vector<2x8x16xbf16>
    %26 = vector.extract_strided_slice %19 {offsets = [0, 64], sizes = [16, 16], strides = [1, 1]} : vector<16x96xf32> to vector<16x16xf32>
    %27 = vector.shape_cast %26 : vector<16x16xf32> to vector<2x8x16xf32>
    %28 = arith.truncf %27 : vector<2x8x16xf32> to vector<2x8x16xbf16>
    "tpu.trace_start"() <{level = 10 : i32, message = "bqd,bkd->bqk"}> : () -> ()
    %cst_25 = arith.constant dense<0.000000e+00> : vector<2x8x8xf32>
    %29 = tpu.matmul %22, %25, %cst_25 {dimension_numbers = #tpu.dot_dimension_numbers<[2], [2], [1], [1], [0, 0, 0, 1, 1, 1], [0], [0]>} : vector<2x8x16xbf16>, vector<2x8x16xbf16>, vector<2x8x8xf32> -> vector<2x8x8xf32>
    "tpu.trace_stop"() : () -> ()
    %cst_26 = arith.constant 2.500000e-01 : f32
    %30 = vector.broadcast %cst_26 : f32 to vector<2x8x8xf32>
    %31 = arith.mulf %29, %30 : vector<2x8x8xf32>
    %32 = vector.broadcast %1 : vector<2x1x8xf32> to vector<2x8x8xf32>
    %33 = arith.addf %31, %32 : vector<2x8x8xf32>
    %cst_27 = arith.constant dense<0xFF800000> : vector<2x8xf32>
    %34 = vector.multi_reduction <maximumf>, %33, %cst_27 [2] : vector<2x8x8xf32> to vector<2x8xf32>
    %35 = vector.shape_cast %34 : vector<2x8xf32> to vector<2x8x1xf32>
    %36 = vector.broadcast %35 : vector<2x8x1xf32> to vector<2x8x8xf32>
    %37 = arith.subf %33, %36 : vector<2x8x8xf32>
    %38 = math.exp %37 : vector<2x8x8xf32>
    %cst_28 = arith.constant dense<0.000000e+00> : vector<2x8xf32>
    %39 = vector.multi_reduction <add>, %38, %cst_28 [2] : vector<2x8x8xf32> to vector<2x8xf32>
    %40 = vector.shape_cast %39 : vector<2x8xf32> to vector<2x8x1xf32>
    %41 = tpu.reciprocal %40 {approx = true} : vector<2x8x1xf32> -> vector<2x8x1xf32>
    %42 = vector.broadcast %41 : vector<2x8x1xf32> to vector<2x8x8xf32>
    %43 = arith.mulf %38, %42 : vector<2x8x8xf32>
    %44 = arith.truncf %43 : vector<2x8x8xf32> to vector<2x8x8xbf16>
    "tpu.trace_start"() <{level = 10 : i32, message = "bqk,bkd->bqd"}> : () -> ()
    %cst_29 = arith.constant dense<0.000000e+00> : vector<2x8x16xf32>
    %45 = tpu.matmul %44, %28, %cst_29 {dimension_numbers = #tpu.dot_dimension_numbers<[2], [1], [1], [2], [0, 0, 0, 1, 1, 2], [0], [0]>} : vector<2x8x8xbf16>, vector<2x8x16xbf16>, vector<2x8x16xf32> -> vector<2x8x16xf32>
    "tpu.trace_stop"() : () -> ()
    %46 = vector.shape_cast %45 : vector<2x8x16xf32> to vector<16x16xf32>
    %47 = vector.extract_strided_slice %19 {offsets = [0, 16], sizes = [16, 16], strides = [1, 1]} : vector<16x96xf32> to vector<16x16xf32>
    %48 = vector.shape_cast %47 : vector<16x16xf32> to vector<2x8x16xf32>
    %49 = arith.truncf %48 : vector<2x8x16xf32> to vector<2x8x16xbf16>
    %50 = vector.extract_strided_slice %19 {offsets = [0, 48], sizes = [16, 16], strides = [1, 1]} : vector<16x96xf32> to vector<16x16xf32>
    %51 = vector.shape_cast %50 : vector<16x16xf32> to vector<2x8x16xf32>
    %52 = arith.truncf %51 : vector<2x8x16xf32> to vector<2x8x16xbf16>
    %53 = vector.extract_strided_slice %19 {offsets = [0, 80], sizes = [16, 16], strides = [1, 1]} : vector<16x96xf32> to vector<16x16xf32>
    %54 = vector.shape_cast %53 : vector<16x16xf32> to vector<2x8x16xf32>
    %55 = arith.truncf %54 : vector<2x8x16xf32> to vector<2x8x16xbf16>
    "tpu.trace_start"() <{level = 10 : i32, message = "bqd,bkd->bqk"}> : () -> ()
    %cst_30 = arith.constant dense<0.000000e+00> : vector<2x8x8xf32>
    %56 = tpu.matmul %49, %52, %cst_30 {dimension_numbers = #tpu.dot_dimension_numbers<[2], [2], [1], [1], [0, 0, 0, 1, 1, 1], [0], [0]>} : vector<2x8x16xbf16>, vector<2x8x16xbf16>, vector<2x8x8xf32> -> vector<2x8x8xf32>
    "tpu.trace_stop"() : () -> ()
    %cst_31 = arith.constant 2.500000e-01 : f32
    %57 = vector.broadcast %cst_31 : f32 to vector<2x8x8xf32>
    %58 = arith.mulf %56, %57 : vector<2x8x8xf32>
    %59 = vector.broadcast %1 : vector<2x1x8xf32> to vector<2x8x8xf32>
    %60 = arith.addf %58, %59 : vector<2x8x8xf32>
    %cst_32 = arith.constant dense<0xFF800000> : vector<2x8xf32>
    %61 = vector.multi_reduction <maximumf>, %60, %cst_32 [2] : vector<2x8x8xf32> to vector<2x8xf32>
    %62 = vector.shape_cast %61 : vector<2x8xf32> to vector<2x8x1xf32>
    %63 = vector.broadcast %62 : vector<2x8x1xf32> to vector<2x8x8xf32>
    %64 = arith.subf %60, %63 : vector<2x8x8xf32>
    %65 = math.exp %64 : vector<2x8x8xf32>
    %cst_33 = arith.constant dense<0.000000e+00> : vector<2x8xf32>
    %66 = vector.multi_reduction <add>, %65, %cst_33 [2] : vector<2x8x8xf32> to vector<2x8xf32>
    %67 = vector.shape_cast %66 : vector<2x8xf32> to vector<2x8x1xf32>
    %68 = tpu.reciprocal %67 {approx = true} : vector<2x8x1xf32> -> vector<2x8x1xf32>
    %69 = vector.broadcast %68 : vector<2x8x1xf32> to vector<2x8x8xf32>
    %70 = arith.mulf %65, %69 : vector<2x8x8xf32>
    %71 = arith.truncf %70 : vector<2x8x8xf32> to vector<2x8x8xbf16>
    "tpu.trace_start"() <{level = 10 : i32, message = "bqk,bkd->bqd"}> : () -> ()
    %cst_34 = arith.constant dense<0.000000e+00> : vector<2x8x16xf32>
    %72 = tpu.matmul %71, %55, %cst_34 {dimension_numbers = #tpu.dot_dimension_numbers<[2], [1], [1], [2], [0, 0, 0, 1, 1, 2], [0], [0]>} : vector<2x8x8xbf16>, vector<2x8x16xbf16>, vector<2x8x16xf32> -> vector<2x8x16xf32>
    "tpu.trace_stop"() : () -> ()
    %73 = vector.shape_cast %72 : vector<2x8x16xf32> to vector<16x16xf32>
    %74 = tpu.concatenate %46, %73 in 1 : vector<16x16xf32>, vector<16x16xf32> -> vector<16x32xf32>
    %75 = arith.truncf %74 : vector<16x32xf32> to vector<16x32xbf16>
    %cst_35 = arith.constant dense<0.000000e+00> : vector<16x32xf32>
    %76 = tpu.matmul %75, %7, %cst_35 {dimension_numbers = #tpu.dot_dimension_numbers<[1], [0], [0], [1], [0, 0, 1, 1], [], []>} : vector<16x32xbf16>, vector<32x32xbf16>, vector<16x32xf32> -> vector<16x32xf32>
    %77 = vector.extract_strided_slice %13 {offsets = [0, 0], sizes = [1, 32], strides = [1, 1]} : vector<6x32xf32> to vector<1x32xf32>
    %78 = vector.broadcast %77 : vector<1x32xf32> to vector<16x32xf32>
    %79 = arith.addf %76, %78 : vector<16x32xf32>
    %80 = arith.addf %0, %79 : vector<16x32xf32>
    %81 = vector.extract_strided_slice %13 {offsets = [2, 0], sizes = [1, 32], strides = [1, 1]} : vector<6x32xf32> to vector<1x32xf32>
    %82 = vector.extract_strided_slice %13 {offsets = [3, 0], sizes = [1, 32], strides = [1, 1]} : vector<6x32xf32> to vector<1x32xf32>
    %cst_36 = arith.constant dense<0.000000e+00> : vector<16xf32>
    %83 = vector.multi_reduction <add>, %80, %cst_36 [1] : vector<16x32xf32> to vector<16xf32>
    %84 = vector.shape_cast %83 : vector<16xf32> to vector<16x1xf32>
    %cst_37 = arith.constant 3.200000e+01 : f32
    %85 = vector.broadcast %cst_37 : f32 to vector<16x1xf32>
    %86 = arith.divf %84, %85 : vector<16x1xf32>
    %87 = vector.broadcast %86 : vector<16x1xf32> to vector<16x32xf32>
    %88 = arith.subf %80, %87 : vector<16x32xf32>
    %89 = arith.mulf %88, %88 : vector<16x32xf32>
    %cst_38 = arith.constant dense<0.000000e+00> : vector<16xf32>
    %90 = vector.multi_reduction <add>, %89, %cst_38 [1] : vector<16x32xf32> to vector<16xf32>
    %91 = vector.shape_cast %90 : vector<16xf32> to vector<16x1xf32>
    %cst_39 = arith.constant 3.200000e+01 : f32
    %92 = vector.broadcast %cst_39 : f32 to vector<16x1xf32>
    %93 = arith.divf %91, %92 : vector<16x1xf32>
    %94 = vector.broadcast %86 : vector<16x1xf32> to vector<16x32xf32>
    %95 = arith.subf %80, %94 : vector<16x32xf32>
    %cst_40 = arith.constant 9.99999996E-13 : f32
    %96 = vector.broadcast %cst_40 : f32 to vector<16x1xf32>
    %97 = arith.addf %93, %96 : vector<16x1xf32>
    %98 = math.rsqrt %97 : vector<16x1xf32>
    %99 = vector.broadcast %98 : vector<16x1xf32> to vector<16x32xf32>
    %100 = arith.mulf %95, %99 : vector<16x32xf32>
    %101 = vector.broadcast %81 : vector<1x32xf32> to vector<16x32xf32>
    %102 = arith.mulf %100, %101 : vector<16x32xf32>
    %103 = vector.broadcast %82 : vector<1x32xf32> to vector<16x32xf32>
    %104 = arith.addf %102, %103 : vector<16x32xf32>
    %105 = arith.truncf %104 : vector<16x32xf32> to vector<16x32xbf16>
    %cst_41 = arith.constant dense<0.000000e+00> : vector<16x64xf32>
    %106 = tpu.matmul %105, %9, %cst_41 {dimension_numbers = #tpu.dot_dimension_numbers<[1], [0], [0], [1], [0, 0, 1, 1], [], []>} : vector<16x32xbf16>, vector<32x64xbf16>, vector<16x64xf32> -> vector<16x64xf32>
    %107 = vector.broadcast %15 : vector<1x64xf32> to vector<16x64xf32>
    %108 = arith.addf %106, %107 : vector<16x64xf32>
    %cst_42 = arith.constant 5.000000e-01 : f32
    %109 = vector.broadcast %cst_42 : f32 to vector<16x64xf32>
    %110 = arith.mulf %109, %108 : vector<16x64xf32>
    %cst_43 = arith.constant 4.471500e-02 : f32
    %111 = vector.broadcast %cst_43 : f32 to vector<16x64xf32>
    %112 = arith.mulf %111, %108 : vector<16x64xf32>
    %113 = arith.mulf %112, %108 : vector<16x64xf32>
    %114 = arith.mulf %113, %108 : vector<16x64xf32>
    %115 = arith.addf %108, %114 : vector<16x64xf32>
    %cst_44 = arith.constant 0.797884583 : f32
    %116 = vector.broadcast %cst_44 : f32 to vector<16x64xf32>
    %117 = arith.mulf %116, %115 : vector<16x64xf32>
    %118 = math.tanh %117 : vector<16x64xf32>
    %cst_45 = arith.constant 1.000000e+00 : f32
    %119 = vector.broadcast %cst_45 : f32 to vector<16x64xf32>
    %120 = arith.addf %119, %118 : vector<16x64xf32>
    %121 = arith.mulf %110, %120 : vector<16x64xf32>
    %122 = arith.truncf %121 : vector<16x64xf32> to vector<16x64xbf16>
    %cst_46 = arith.constant dense<0.000000e+00> : vector<16x32xf32>
    %123 = tpu.matmul %122, %11, %cst_46 {dimension_numbers = #tpu.dot_dimension_numbers<[1], [0], [0], [1], [0, 0, 1, 1], [], []>} : vector<16x64xbf16>, vector<64x32xbf16>, vector<16x32xf32> -> vector<16x32xf32>
    %124 = vector.extract_strided_slice %13 {offsets = [1, 0], sizes = [1, 32], strides = [1, 1]} : vector<6x32xf32> to vector<1x32xf32>
    %125 = vector.broadcast %124 : vector<1x32xf32> to vector<16x32xf32>
    %126 = arith.addf %123, %125 : vector<16x32xf32>
    %127 = arith.addf %104, %126 : vector<16x32xf32>
    %128 = vector.extract_strided_slice %13 {offsets = [4, 0], sizes = [1, 32], strides = [1, 1]} : vector<6x32xf32> to vector<1x32xf32>
    %129 = vector.extract_strided_slice %13 {offsets = [5, 0], sizes = [1, 32], strides = [1, 1]} : vector<6x32xf32> to vector<1x32xf32>
    %cst_47 = arith.constant dense<0.000000e+00> : vector<16xf32>
    %130 = vector.multi_reduction <add>, %127, %cst_47 [1] : vector<16x32xf32> to vector<16xf32>
    %131 = vector.shape_cast %130 : vector<16xf32> to vector<16x1xf32>
    %cst_48 = arith.constant 3.200000e+01 : f32
    %132 = vector.broadcast %cst_48 : f32 to vector<16x1xf32>
    %133 = arith.divf %131, %132 : vector<16x1xf32>
    %134 = vector.broadcast %133 : vector<16x1xf32> to vector<16x32xf32>
    %135 = arith.subf %127, %134 : vector<16x32xf32>
    %136 = arith.mulf %135, %135 : vector<16x32xf32>
    %cst_49 = arith.constant dense<0.000000e+00> : vector<16xf32>
    %137 = vector.multi_reduction <add>, %136, %cst_49 [1] : vector<16x32xf32> to vector<16xf32>
    %138 = vector.shape_cast %137 : vector<16xf32> to vector<16x1xf32>
    %cst_50 = arith.constant 3.200000e+01 : f32
    %139 = vector.broadcast %cst_50 : f32 to vector<16x1xf32>
    %140 = arith.divf %138, %139 : vector<16x1xf32>
    %141 = vector.broadcast %133 : vector<16x1xf32> to vector<16x32xf32>
    %142 = arith.subf %127, %141 : vector<16x32xf32>
    %cst_51 = arith.constant 9.99999996E-13 : f32
    %143 = vector.broadcast %cst_51 : f32 to vector<16x1xf32>
    %144 = arith.addf %140, %143 : vector<16x1xf32>
    %145 = math.rsqrt %144 : vector<16x1xf32>
    %146 = vector.broadcast %145 : vector<16x1xf32> to vector<16x32xf32>
    %147 = arith.mulf %142, %146 : vector<16x32xf32>
    %148 = vector.broadcast %128 : vector<1x32xf32> to vector<16x32xf32>
    %149 = arith.mulf %147, %148 : vector<16x32xf32>
    %150 = vector.broadcast %129 : vector<1x32xf32> to vector<16x32xf32>
    %151 = arith.addf %149, %150 : vector<16x32xf32>
    %c1 = arith.constant 1 : index
    %c0_52 = arith.constant 0 : index
    %c0_53 = arith.constant 0 : index
    %152 = vector.load %arg3[%c1, %c0_52, %c0_53] : memref<2x32x96xbf16, #tpu.memory_space<vmem>>, vector<1x32x96xbf16>
    %153 = vector.shape_cast %152 : vector<1x32x96xbf16> to vector<32x96xbf16>
    %c1_54 = arith.constant 1 : index
    %c0_55 = arith.constant 0 : index
    %c0_56 = arith.constant 0 : index
    %154 = vector.load %arg4[%c1_54, %c0_55, %c0_56] : memref<2x1x96xf32, #tpu.memory_space<vmem>>, vector<1x1x96xf32>
    %155 = vector.shape_cast %154 : vector<1x1x96xf32> to vector<1x96xf32>
    %c1_57 = arith.constant 1 : index
    %c0_58 = arith.constant 0 : index
    %c0_59 = arith.constant 0 : index
    %156 = vector.load %arg5[%c1_57, %c0_58, %c0_59] : memref<2x32x32xbf16, #tpu.memory_space<vmem>>, vector<1x32x32xbf16>
    %157 = vector.shape_cast %156 : vector<1x32x32xbf16> to vector<32x32xbf16>
    %c1_60 = arith.constant 1 : index
    %c0_61 = arith.constant 0 : index
    %c0_62 = arith.constant 0 : index
    %158 = vector.load %arg6[%c1_60, %c0_61, %c0_62] : memref<2x32x64xbf16, #tpu.memory_space<vmem>>, vector<1x32x64xbf16>
    %159 = vector.shape_cast %158 : vector<1x32x64xbf16> to vector<32x64xbf16>
    %c1_63 = arith.constant 1 : index
    %c0_64 = arith.constant 0 : index
    %c0_65 = arith.constant 0 : index
    %160 = vector.load %arg7[%c1_63, %c0_64, %c0_65] : memref<2x64x32xbf16, #tpu.memory_space<vmem>>, vector<1x64x32xbf16>
    %161 = vector.shape_cast %160 : vector<1x64x32xbf16> to vector<64x32xbf16>
    %c1_66 = arith.constant 1 : index
    %c0_67 = arith.constant 0 : index
    %c0_68 = arith.constant 0 : index
    %162 = vector.load %arg8[%c1_66, %c0_67, %c0_68] : memref<2x6x32xf32, #tpu.memory_space<vmem>>, vector<1x6x32xf32>
    %163 = vector.shape_cast %162 : vector<1x6x32xf32> to vector<6x32xf32>
    %c1_69 = arith.constant 1 : index
    %c0_70 = arith.constant 0 : index
    %c0_71 = arith.constant 0 : index
    %164 = vector.load %arg9[%c1_69, %c0_70, %c0_71] : memref<2x1x64xf32, #tpu.memory_space<vmem>>, vector<1x1x64xf32>
    %165 = vector.shape_cast %164 : vector<1x1x64xf32> to vector<1x64xf32>
    %166 = arith.truncf %151 : vector<16x32xf32> to vector<16x32xbf16>
    %cst_72 = arith.constant dense<0.000000e+00> : vector<16x96xf32>
    %167 = tpu.matmul %166, %153, %cst_72 {dimension_numbers = #tpu.dot_dimension_numbers<[1], [0], [0], [1], [0, 0, 1, 1], [], []>} : vector<16x32xbf16>, vector<32x96xbf16>, vector<16x96xf32> -> vector<16x96xf32>
    %168 = vector.broadcast %155 : vector<1x96xf32> to vector<16x96xf32>
    %169 = arith.addf %167, %168 : vector<16x96xf32>
    %170 = vector.extract_strided_slice %169 {offsets = [0, 0], sizes = [16, 16], strides = [1, 1]} : vector<16x96xf32> to vector<16x16xf32>
    %171 = vector.shape_cast %170 : vector<16x16xf32> to vector<2x8x16xf32>
    %172 = arith.truncf %171 : vector<2x8x16xf32> to vector<2x8x16xbf16>
    %173 = vector.extract_strided_slice %169 {offsets = [0, 32], sizes = [16, 16], strides = [1, 1]} : vector<16x96xf32> to vector<16x16xf32>
    %174 = vector.shape_cast %173 : vector<16x16xf32> to vector<2x8x16xf32>
    %175 = arith.truncf %174 : vector<2x8x16xf32> to vector<2x8x16xbf16>
    %176 = vector.extract_strided_slice %169 {offsets = [0, 64], sizes = [16, 16], strides = [1, 1]} : vector<16x96xf32> to vector<16x16xf32>
    %177 = vector.shape_cast %176 : vector<16x16xf32> to vector<2x8x16xf32>
    %178 = arith.truncf %177 : vector<2x8x16xf32> to vector<2x8x16xbf16>
    "tpu.trace_start"() <{level = 10 : i32, message = "bqd,bkd->bqk"}> : () -> ()
    %cst_73 = arith.constant dense<0.000000e+00> : vector<2x8x8xf32>
    %179 = tpu.matmul %172, %175, %cst_73 {dimension_numbers = #tpu.dot_dimension_numbers<[2], [2], [1], [1], [0, 0, 0, 1, 1, 1], [0], [0]>} : vector<2x8x16xbf16>, vector<2x8x16xbf16>, vector<2x8x8xf32> -> vector<2x8x8xf32>
    "tpu.trace_stop"() : () -> ()
    %cst_74 = arith.constant 2.500000e-01 : f32
    %180 = vector.broadcast %cst_74 : f32 to vector<2x8x8xf32>
    %181 = arith.mulf %179, %180 : vector<2x8x8xf32>
    %182 = vector.broadcast %1 : vector<2x1x8xf32> to vector<2x8x8xf32>
    %183 = arith.addf %181, %182 : vector<2x8x8xf32>
    %cst_75 = arith.constant dense<0xFF800000> : vector<2x8xf32>
    %184 = vector.multi_reduction <maximumf>, %183, %cst_75 [2] : vector<2x8x8xf32> to vector<2x8xf32>
    %185 = vector.shape_cast %184 : vector<2x8xf32> to vector<2x8x1xf32>
    %186 = vector.broadcast %185 : vector<2x8x1xf32> to vector<2x8x8xf32>
    %187 = arith.subf %183, %186 : vector<2x8x8xf32>
    %188 = math.exp %187 : vector<2x8x8xf32>
    %cst_76 = arith.constant dense<0.000000e+00> : vector<2x8xf32>
    %189 = vector.multi_reduction <add>, %188, %cst_76 [2] : vector<2x8x8xf32> to vector<2x8xf32>
    %190 = vector.shape_cast %189 : vector<2x8xf32> to vector<2x8x1xf32>
    %191 = tpu.reciprocal %190 {approx = true} : vector<2x8x1xf32> -> vector<2x8x1xf32>
    %192 = vector.broadcast %191 : vector<2x8x1xf32> to vector<2x8x8xf32>
    %193 = arith.mulf %188, %192 : vector<2x8x8xf32>
    %194 = arith.truncf %193 : vector<2x8x8xf32> to vector<2x8x8xbf16>
    "tpu.trace_start"() <{level = 10 : i32, message = "bqk,bkd->bqd"}> : () -> ()
    %cst_77 = arith.constant dense<0.000000e+00> : vector<2x8x16xf32>
    %195 = tpu.matmul %194, %178, %cst_77 {dimension_numbers = #tpu.dot_dimension_numbers<[2], [1], [1], [2], [0, 0, 0, 1, 1, 2], [0], [0]>} : vector<2x8x8xbf16>, vector<2x8x16xbf16>, vector<2x8x16xf32> -> vector<2x8x16xf32>
    "tpu.trace_stop"() : () -> ()
    %196 = vector.shape_cast %195 : vector<2x8x16xf32> to vector<16x16xf32>
    %197 = vector.extract_strided_slice %169 {offsets = [0, 16], sizes = [16, 16], strides = [1, 1]} : vector<16x96xf32> to vector<16x16xf32>
    %198 = vector.shape_cast %197 : vector<16x16xf32> to vector<2x8x16xf32>
    %199 = arith.truncf %198 : vector<2x8x16xf32> to vector<2x8x16xbf16>
    %200 = vector.extract_strided_slice %169 {offsets = [0, 48], sizes = [16, 16], strides = [1, 1]} : vector<16x96xf32> to vector<16x16xf32>
    %201 = vector.shape_cast %200 : vector<16x16xf32> to vector<2x8x16xf32>
    %202 = arith.truncf %201 : vector<2x8x16xf32> to vector<2x8x16xbf16>
    %203 = vector.extract_strided_slice %169 {offsets = [0, 80], sizes = [16, 16], strides = [1, 1]} : vector<16x96xf32> to vector<16x16xf32>
    %204 = vector.shape_cast %203 : vector<16x16xf32> to vector<2x8x16xf32>
    %205 = arith.truncf %204 : vector<2x8x16xf32> to vector<2x8x16xbf16>
    "tpu.trace_start"() <{level = 10 : i32, message = "bqd,bkd->bqk"}> : () -> ()
    %cst_78 = arith.constant dense<0.000000e+00> : vector<2x8x8xf32>
    %206 = tpu.matmul %199, %202, %cst_78 {dimension_numbers = #tpu.dot_dimension_numbers<[2], [2], [1], [1], [0, 0, 0, 1, 1, 1], [0], [0]>} : vector<2x8x16xbf16>, vector<2x8x16xbf16>, vector<2x8x8xf32> -> vector<2x8x8xf32>
    "tpu.trace_stop"() : () -> ()
    %cst_79 = arith.constant 2.500000e-01 : f32
    %207 = vector.broadcast %cst_79 : f32 to vector<2x8x8xf32>
    %208 = arith.mulf %206, %207 : vector<2x8x8xf32>
    %209 = vector.broadcast %1 : vector<2x1x8xf32> to vector<2x8x8xf32>
    %210 = arith.addf %208, %209 : vector<2x8x8xf32>
    %cst_80 = arith.constant dense<0xFF800000> : vector<2x8xf32>
    %211 = vector.multi_reduction <maximumf>, %210, %cst_80 [2] : vector<2x8x8xf32> to vector<2x8xf32>
    %212 = vector.shape_cast %211 : vector<2x8xf32> to vector<2x8x1xf32>
    %213 = vector.broadcast %212 : vector<2x8x1xf32> to vector<2x8x8xf32>
    %214 = arith.subf %210, %213 : vector<2x8x8xf32>
    %215 = math.exp %214 : vector<2x8x8xf32>
    %cst_81 = arith.constant dense<0.000000e+00> : vector<2x8xf32>
    %216 = vector.multi_reduction <add>, %215, %cst_81 [2] : vector<2x8x8xf32> to vector<2x8xf32>
    %217 = vector.shape_cast %216 : vector<2x8xf32> to vector<2x8x1xf32>
    %218 = tpu.reciprocal %217 {approx = true} : vector<2x8x1xf32> -> vector<2x8x1xf32>
    %219 = vector.broadcast %218 : vector<2x8x1xf32> to vector<2x8x8xf32>
    %220 = arith.mulf %215, %219 : vector<2x8x8xf32>
    %221 = arith.truncf %220 : vector<2x8x8xf32> to vector<2x8x8xbf16>
    "tpu.trace_start"() <{level = 10 : i32, message = "bqk,bkd->bqd"}> : () -> ()
    %cst_82 = arith.constant dense<0.000000e+00> : vector<2x8x16xf32>
    %222 = tpu.matmul %221, %205, %cst_82 {dimension_numbers = #tpu.dot_dimension_numbers<[2], [1], [1], [2], [0, 0, 0, 1, 1, 2], [0], [0]>} : vector<2x8x8xbf16>, vector<2x8x16xbf16>, vector<2x8x16xf32> -> vector<2x8x16xf32>
    "tpu.trace_stop"() : () -> ()
    %223 = vector.shape_cast %222 : vector<2x8x16xf32> to vector<16x16xf32>
    %224 = tpu.concatenate %196, %223 in 1 : vector<16x16xf32>, vector<16x16xf32> -> vector<16x32xf32>
    %225 = arith.truncf %224 : vector<16x32xf32> to vector<16x32xbf16>
    %cst_83 = arith.constant dense<0.000000e+00> : vector<16x32xf32>
    %226 = tpu.matmul %225, %157, %cst_83 {dimension_numbers = #tpu.dot_dimension_numbers<[1], [0], [0], [1], [0, 0, 1, 1], [], []>} : vector<16x32xbf16>, vector<32x32xbf16>, vector<16x32xf32> -> vector<16x32xf32>
    %227 = vector.extract_strided_slice %163 {offsets = [0, 0], sizes = [1, 32], strides = [1, 1]} : vector<6x32xf32> to vector<1x32xf32>
    %228 = vector.broadcast %227 : vector<1x32xf32> to vector<16x32xf32>
    %229 = arith.addf %226, %228 : vector<16x32xf32>
    %230 = arith.addf %151, %229 : vector<16x32xf32>
    %231 = vector.extract_strided_slice %163 {offsets = [2, 0], sizes = [1, 32], strides = [1, 1]} : vector<6x32xf32> to vector<1x32xf32>
    %232 = vector.extract_strided_slice %163 {offsets = [3, 0], sizes = [1, 32], strides = [1, 1]} : vector<6x32xf32> to vector<1x32xf32>
    %cst_84 = arith.constant dense<0.000000e+00> : vector<16xf32>
    %233 = vector.multi_reduction <add>, %230, %cst_84 [1] : vector<16x32xf32> to vector<16xf32>
    %234 = vector.shape_cast %233 : vector<16xf32> to vector<16x1xf32>
    %cst_85 = arith.constant 3.200000e+01 : f32
    %235 = vector.broadcast %cst_85 : f32 to vector<16x1xf32>
    %236 = arith.divf %234, %235 : vector<16x1xf32>
    %237 = vector.broadcast %236 : vector<16x1xf32> to vector<16x32xf32>
    %238 = arith.subf %230, %237 : vector<16x32xf32>
    %239 = arith.mulf %238, %238 : vector<16x32xf32>
    %cst_86 = arith.constant dense<0.000000e+00> : vector<16xf32>
    %240 = vector.multi_reduction <add>, %239, %cst_86 [1] : vector<16x32xf32> to vector<16xf32>
    %241 = vector.shape_cast %240 : vector<16xf32> to vector<16x1xf32>
    %cst_87 = arith.constant 3.200000e+01 : f32
    %242 = vector.broadcast %cst_87 : f32 to vector<16x1xf32>
    %243 = arith.divf %241, %242 : vector<16x1xf32>
    %244 = vector.broadcast %236 : vector<16x1xf32> to vector<16x32xf32>
    %245 = arith.subf %230, %244 : vector<16x32xf32>
    %cst_88 = arith.constant 9.99999996E-13 : f32
    %246 = vector.broadcast %cst_88 : f32 to vector<16x1xf32>
    %247 = arith.addf %243, %246 : vector<16x1xf32>
    %248 = math.rsqrt %247 : vector<16x1xf32>
    %249 = vector.broadcast %248 : vector<16x1xf32> to vector<16x32xf32>
    %250 = arith.mulf %245, %249 : vector<16x32xf32>
    %251 = vector.broadcast %231 : vector<1x32xf32> to vector<16x32xf32>
    %252 = arith.mulf %250, %251 : vector<16x32xf32>
    %253 = vector.broadcast %232 : vector<1x32xf32> to vector<16x32xf32>
    %254 = arith.addf %252, %253 : vector<16x32xf32>
    %255 = arith.truncf %254 : vector<16x32xf32> to vector<16x32xbf16>
    %cst_89 = arith.constant dense<0.000000e+00> : vector<16x64xf32>
    %256 = tpu.matmul %255, %159, %cst_89 {dimension_numbers = #tpu.dot_dimension_numbers<[1], [0], [0], [1], [0, 0, 1, 1], [], []>} : vector<16x32xbf16>, vector<32x64xbf16>, vector<16x64xf32> -> vector<16x64xf32>
    %257 = vector.broadcast %165 : vector<1x64xf32> to vector<16x64xf32>
    %258 = arith.addf %256, %257 : vector<16x64xf32>
    %cst_90 = arith.constant 5.000000e-01 : f32
    %259 = vector.broadcast %cst_90 : f32 to vector<16x64xf32>
    %260 = arith.mulf %259, %258 : vector<16x64xf32>
    %cst_91 = arith.constant 4.471500e-02 : f32
    %261 = vector.broadcast %cst_91 : f32 to vector<16x64xf32>
    %262 = arith.mulf %261, %258 : vector<16x64xf32>
    %263 = arith.mulf %262, %258 : vector<16x64xf32>
    %264 = arith.mulf %263, %258 : vector<16x64xf32>
    %265 = arith.addf %258, %264 : vector<16x64xf32>
    %cst_92 = arith.constant 0.797884583 : f32
    %266 = vector.broadcast %cst_92 : f32 to vector<16x64xf32>
    %267 = arith.mulf %266, %265 : vector<16x64xf32>
    %268 = math.tanh %267 : vector<16x64xf32>
    %cst_93 = arith.constant 1.000000e+00 : f32
    %269 = vector.broadcast %cst_93 : f32 to vector<16x64xf32>
    %270 = arith.addf %269, %268 : vector<16x64xf32>
    %271 = arith.mulf %260, %270 : vector<16x64xf32>
    %272 = arith.truncf %271 : vector<16x64xf32> to vector<16x64xbf16>
    %cst_94 = arith.constant dense<0.000000e+00> : vector<16x32xf32>
    %273 = tpu.matmul %272, %161, %cst_94 {dimension_numbers = #tpu.dot_dimension_numbers<[1], [0], [0], [1], [0, 0, 1, 1], [], []>} : vector<16x64xbf16>, vector<64x32xbf16>, vector<16x32xf32> -> vector<16x32xf32>
    %274 = vector.extract_strided_slice %163 {offsets = [1, 0], sizes = [1, 32], strides = [1, 1]} : vector<6x32xf32> to vector<1x32xf32>
    %275 = vector.broadcast %274 : vector<1x32xf32> to vector<16x32xf32>
    %276 = arith.addf %273, %275 : vector<16x32xf32>
    %277 = arith.addf %254, %276 : vector<16x32xf32>
    %278 = vector.extract_strided_slice %163 {offsets = [4, 0], sizes = [1, 32], strides = [1, 1]} : vector<6x32xf32> to vector<1x32xf32>
    %279 = vector.extract_strided_slice %163 {offsets = [5, 0], sizes = [1, 32], strides = [1, 1]} : vector<6x32xf32> to vector<1x32xf32>
    %cst_95 = arith.constant dense<0.000000e+00> : vector<16xf32>
    %280 = vector.multi_reduction <add>, %277, %cst_95 [1] : vector<16x32xf32> to vector<16xf32>
    %281 = vector.shape_cast %280 : vector<16xf32> to vector<16x1xf32>
    %cst_96 = arith.constant 3.200000e+01 : f32
    %282 = vector.broadcast %cst_96 : f32 to vector<16x1xf32>
    %283 = arith.divf %281, %282 : vector<16x1xf32>
    %284 = vector.broadcast %283 : vector<16x1xf32> to vector<16x32xf32>
    %285 = arith.subf %277, %284 : vector<16x32xf32>
    %286 = arith.mulf %285, %285 : vector<16x32xf32>
    %cst_97 = arith.constant dense<0.000000e+00> : vector<16xf32>
    %287 = vector.multi_reduction <add>, %286, %cst_97 [1] : vector<16x32xf32> to vector<16xf32>
    %288 = vector.shape_cast %287 : vector<16xf32> to vector<16x1xf32>
    %cst_98 = arith.constant 3.200000e+01 : f32
    %289 = vector.broadcast %cst_98 : f32 to vector<16x1xf32>
    %290 = arith.divf %288, %289 : vector<16x1xf32>
    %291 = vector.broadcast %283 : vector<16x1xf32> to vector<16x32xf32>
    %292 = arith.subf %277, %291 : vector<16x32xf32>
    %cst_99 = arith.constant 9.99999996E-13 : f32
    %293 = vector.broadcast %cst_99 : f32 to vector<16x1xf32>
    %294 = arith.addf %290, %293 : vector<16x1xf32>
    %295 = math.rsqrt %294 : vector<16x1xf32>
    %296 = vector.broadcast %295 : vector<16x1xf32> to vector<16x32xf32>
    %297 = arith.mulf %292, %296 : vector<16x32xf32>
    %298 = vector.broadcast %278 : vector<1x32xf32> to vector<16x32xf32>
    %299 = arith.mulf %297, %298 : vector<16x32xf32>
    %300 = vector.broadcast %279 : vector<1x32xf32> to vector<16x32xf32>
    %301 = arith.addf %299, %300 : vector<16x32xf32>
    %c0_100 = arith.constant 0 : index
    %c0_101 = arith.constant 0 : index
    %302 = vector.load %arg12[%c0_100, %c0_101] : memref<3x128xf32, #tpu.memory_space<vmem>>, vector<3x128xf32>
    %303 = arith.truncf %301 : vector<16x32xf32> to vector<16x32xbf16>
    %c0_102 = arith.constant 0 : index
    %c0_103 = arith.constant 0 : index
    %304 = vector.load %arg10[%c0_102, %c0_103] : memref<32x128xbf16, #tpu.memory_space<vmem>>, vector<32x128xbf16>
    %cst_104 = arith.constant dense<0.000000e+00> : vector<16x128xf32>
    %305 = tpu.matmul %303, %304, %cst_104 {dimension_numbers = #tpu.dot_dimension_numbers<[1], [0], [0], [1], [0, 0, 1, 1], [], []>} : vector<16x32xbf16>, vector<32x128xbf16>, vector<16x128xf32> -> vector<16x128xf32>
    %306 = vector.extract_strided_slice %302 {offsets = [0, 0], sizes = [1, 128], strides = [1, 1]} : vector<3x128xf32> to vector<1x128xf32>
    %307 = vector.broadcast %306 : vector<1x128xf32> to vector<16x128xf32>
    %308 = arith.addf %305, %307 : vector<16x128xf32>
    %309 = math.tanh %308 : vector<16x128xf32>
    %310 = arith.truncf %309 : vector<16x128xf32> to vector<16x128xbf16>
    %c0_105 = arith.constant 0 : index
    %c0_106 = arith.constant 0 : index
    %c0_107 = arith.constant 0 : index
    %311 = vector.load %arg11[%c0_105, %c0_106, %c0_107] : memref<2x128x128xbf16, #tpu.memory_space<vmem>>, vector<1x128x128xbf16>
    %312 = vector.shape_cast %311 : vector<1x128x128xbf16> to vector<128x128xbf16>
    %cst_108 = arith.constant dense<0.000000e+00> : vector<16x128xf32>
    %313 = tpu.matmul %310, %312, %cst_108 {dimension_numbers = #tpu.dot_dimension_numbers<[1], [0], [0], [1], [0, 0, 1, 1], [], []>} : vector<16x128xbf16>, vector<128x128xbf16>, vector<16x128xf32> -> vector<16x128xf32>
    %314 = vector.extract_strided_slice %302 {offsets = [1, 0], sizes = [1, 128], strides = [1, 1]} : vector<3x128xf32> to vector<1x128xf32>
    %315 = vector.broadcast %314 : vector<1x128xf32> to vector<16x128xf32>
    %316 = arith.addf %313, %315 : vector<16x128xf32>
    %317 = arith.truncf %316 : vector<16x128xf32> to vector<16x128xbf16>
    %c1_109 = arith.constant 1 : index
    %c0_110 = arith.constant 0 : index
    %c0_111 = arith.constant 0 : index
    %318 = vector.load %arg11[%c1_109, %c0_110, %c0_111] : memref<2x128x128xbf16, #tpu.memory_space<vmem>>, vector<1x128x128xbf16>
    %319 = vector.shape_cast %318 : vector<1x128x128xbf16> to vector<128x128xbf16>
    %cst_112 = arith.constant dense<0.000000e+00> : vector<16x128xf32>
    %320 = tpu.matmul %317, %319, %cst_112 {dimension_numbers = #tpu.dot_dimension_numbers<[1], [0], [0], [1], [0, 0, 1, 1], [], []>} : vector<16x128xbf16>, vector<128x128xbf16>, vector<16x128xf32> -> vector<16x128xf32>
    %321 = vector.extract_strided_slice %302 {offsets = [2, 0], sizes = [1, 128], strides = [1, 1]} : vector<3x128xf32> to vector<1x128xf32>
    %322 = vector.broadcast %321 : vector<1x128xf32> to vector<16x128xf32>
    %323 = arith.addf %320, %322 : vector<16x128xf32>
    %cst_113 = arith.constant 0.000000e+00 : f32
    %324 = vector.broadcast %cst_113 : f32 to vector<16x128xf32>
    %325 = arith.subf %324, %323 : vector<16x128xf32>
    %326 = math.exp %325 : vector<16x128xf32>
    %cst_114 = arith.constant 1.000000e+00 : f32
    %327 = vector.broadcast %cst_114 : f32 to vector<16x128xf32>
    %328 = arith.addf %327, %326 : vector<16x128xf32>
    %cst_115 = arith.constant 1.000000e+00 : f32
    %329 = vector.broadcast %cst_115 : f32 to vector<16x128xf32>
    %330 = arith.divf %329, %328 : vector<16x128xf32>
    %c0_116 = arith.constant 0 : index
    %c0_117 = arith.constant 0 : index
    %331 = vector.load %arg13[%c0_116, %c0_117] : memref<16x128xf32, #tpu.memory_space<vmem>>, vector<16x128xf32>
    tpu.vector_store %arg13[%c0_116, %c0_117], %330 {strides = array<i32>} : memref<16x128xf32, #tpu.memory_space<vmem>>, vector<16x128xf32>,
    return
  }
  func.func @transform_0(%arg0: i32) -> (i32, i32) {
    %c0_i32 = arith.constant 0 : i32
    %c0_i32_0 = arith.constant 0 : i32
    %c0_i32_1 = arith.constant 0 : i32
    return %c0_i32, %c0_i32_0 : i32, i32
  }
  func.func @transform_1(%arg0: i32) -> (i32, i32, i32) {
    %c0_i32 = arith.constant 0 : i32
    %c0_i32_0 = arith.constant 0 : i32
    %c0_i32_1 = arith.constant 0 : i32
    %c0_i32_2 = arith.constant 0 : i32
    return %c0_i32, %c0_i32_0, %c0_i32_1 : i32, i32, i32
  }
  func.func @transform_2(%arg0: i32) -> (i32, i32, i32) {
    %c0_i32 = arith.constant 0 : i32
    %c0_i32_0 = arith.constant 0 : i32
    %c0_i32_1 = arith.constant 0 : i32
    %c0_i32_2 = arith.constant 0 : i32
    return %c0_i32, %c0_i32_0, %c0_i32_1 : i32, i32, i32
  }
  func.func @transform_3(%arg0: i32) -> (i32, i32, i32) {
    %c0_i32 = arith.constant 0 : i32
    %c0_i32_0 = arith.constant 0 : i32
    %c0_i32_1 = arith.constant 0 : i32
    %c0_i32_2 = arith.constant 0 : i32
    return %c0_i32, %c0_i32_0, %c0_i32_1 : i32, i32, i32
  }
  func.func @transform_4(%arg0: i32) -> (i32, i32, i32) {
    %c0_i32 = arith.constant 0 : i32
    %c0_i32_0 = arith.constant 0 : i32
    %c0_i32_1 = arith.constant 0 : i32
    %c0_i32_2 = arith.constant 0 : i32
    return %c0_i32, %c0_i32_0, %c0_i32_1 : i32, i32, i32
  }
  func.func @transform_5(%arg0: i32) -> (i32, i32, i32) {
    %c0_i32 = arith.constant 0 : i32
    %c0_i32_0 = arith.constant 0 : i32
    %c0_i32_1 = arith.constant 0 : i32
    %c0_i32_2 = arith.constant 0 : i32
    return %c0_i32, %c0_i32_0, %c0_i32_1 : i32, i32, i32
  }
  func.func @transform_6(%arg0: i32) -> (i32, i32, i32) {
    %c0_i32 = arith.constant 0 : i32
    %c0_i32_0 = arith.constant 0 : i32
    %c0_i32_1 = arith.constant 0 : i32
    %c0_i32_2 = arith.constant 0 : i32
    return %c0_i32, %c0_i32_0, %c0_i32_1 : i32, i32, i32
  }
  func.func @transform_7(%arg0: i32) -> (i32, i32, i32) {
    %c0_i32 = arith.constant 0 : i32
    %c0_i32_0 = arith.constant 0 : i32
    %c0_i32_1 = arith.constant 0 : i32
    %c0_i32_2 = arith.constant 0 : i32
    return %c0_i32, %c0_i32_0, %c0_i32_1 : i32, i32, i32
  }
  func.func @transform_8(%arg0: i32) -> (i32, i32, i32) {
    %c0_i32 = arith.constant 0 : i32
    %c0_i32_0 = arith.constant 0 : i32
    %c0_i32_1 = arith.constant 0 : i32
    %c0_i32_2 = arith.constant 0 : i32
    return %c0_i32, %c0_i32_0, %c0_i32_1 : i32, i32, i32
  }
  func.func @transform_9(%arg0: i32) -> (i32, i32) {
    %c0_i32 = arith.constant 0 : i32
    %c0_i32_0 = arith.constant 0 : i32
    %c0_i32_1 = arith.constant 0 : i32
    return %c0_i32, %c0_i32_0 : i32, i32
  }
  func.func @transform_10(%arg0: i32) -> (i32, i32, i32) {
    %c0_i32 = arith.constant 0 : i32
    %c0_i32_0 = arith.constant 0 : i32
    %c0_i32_1 = arith.constant 0 : i32
    %c0_i32_2 = arith.constant 0 : i32
    return %c0_i32, %c0_i32_0, %c0_i32_1 : i32, i32, i32
  }
  func.func @transform_11(%arg0: i32) -> (i32, i32) {
    %c0_i32 = arith.constant 0 : i32
    %c0_i32_0 = arith.constant 0 : i32
    %c0_i32_1 = arith.constant 0 : i32
    return %c0_i32, %c0_i32_0 : i32, i32
  }
  func.func @transform_12(%arg0: i32) -> (i32, i32) {
    %c0_i32 = arith.constant 0 : i32
    %c0_i32_0 = arith.constant 0 : i32
    %c0_i32_1 = arith.constant 0 : i32
    return %c0_i32, %c0_i32_0 : i32, i32
  }
}

</mosaic_0001>

<bundles_post_ra>
// kernel: forward.1
= control target key start
LH: loop header
LB: loop body
LE: loop exit
PB: predicated region body
PF: predicated region fallthrough
CT: control target
= control target key end

     0   :  { %v2585_v0 = vmov 0.0   ;;  %vm2586_vm0 = vmmov 0   ;;  %vm88_vm1 = vcmask 261120   ;;  %vm138_vm2 = vcmask 130048   ;;  %s2588_s17 = smov 64   ;;  %s2590_s18 = smov 112   ;;  %s3141_s2 = inlined_call_operand.vmem [shape: bf16[2,32,96], index: 2, kind: input, shape index: {}]   ;;  %s3142_s0 = inlined_call_operand.vmem [shape: f32[16,32], index: 0, kind: input, shape index: {}]   ;;  %s3143_s3 = inlined_call_operand.vmem [shape: f32[2,1,96], index: 3, kind: input, shape index: {}]   ;;  %s3144_s1 = inlined_call_operand.vmem [shape: f32[2,1,8], index: 1, kind: input, shape index: {}]   ;;  %s3145_s4 = inlined_call_operand.vmem [shape: bf16[2,32,32], index: 4, kind: input, shape index: {}]   ;;  %s3146_s7 = inlined_call_operand.vmem [shape: f32[2,6,32], index: 7, kind: input, shape index: {}]   ;;  %s3147_s5 = inlined_call_operand.vmem [shape: bf16[2,32,64], index: 5, kind: input, shape index: {}]   ;;  %s3148_s6 = inlined_call_operand.vmem [shape: bf16[2,64,32], index: 6, kind: input, shape index: {}]   ;;  %s3149_s8 = inlined_call_operand.vmem [shape: f32[2,1,64], index: 8, kind: input, shape index: {}]   ;;  %s3150_s9 = inlined_call_operand.vmem [shape: bf16[32,128], index: 9, kind: input, shape index: {}]   ;;  %s3151_s10 = inlined_call_operand.vmem [shape: bf16[2,128,128], index: 10, kind: input, shape index: {}]   ;;  %s3152_s11 = inlined_call_operand.vmem [shape: f32[3,128], index: 11, kind: input, shape index: {}]   ;;  %s3153_s12 = inlined_call_operand.vmem [shape: f32[16,128], index: 12, kind: output, shape index: {}]  }
   0x1   :  { %2245 = vmatprep.subr.bf16.mxu0 %v2585_v0  ;;  %v2479_v1 = vld [vmem:[%s3141_s2 + $0x8] sm:$0xff]   ;;  %2249 = vmatprep.mubr.msk.bf16.mxu0 %vm2586_vm0, %v2585_v0  ;;  %v2480_v2 = vld [vmem:[%s3141_s2] sm:$0xff]   ;;  %vm250_vm3 = vcmask 64512   ;;  %vm280_vm4 = vcmask 1043456   ;;  %s2591_s19 = smov 48   ;;  %s2592_s24 = smov 16  }
   0x2   :  { %2253 = vmatprep.subr.bf16.mxu1 %v2585_v0  ;;  %2255 = vmatprep.mubr.msk.bf16.mxu1 %vm2586_vm0, %v2585_v0  ;;  %v2673_v3 = vld [vmem:[%s3142_s0] sm:$0xff]  ;;  %v2678_v4 = vld [vmem:[%s3142_s0 + $0x8] sm:$0xff]  ;;  %s2587_s0 = smov 96   ;;  %vm818_vm5 = vcmask 523264  }
   0x3   :  { %2246 = vmatpush3.bf16.msra.mxu0 %v2479_v1  ;;  %v69_v5 = vpack.c.bf16 %v2678_v4, %v2673_v3  ;;  %v2056_v6 = vld [vmem:[%s3143_s3] ss:$0 sm:$0xff]  ;;  %v2719_v26 = vld [vmem:[%s3144_s1 + $0x1] ss:$0 sm:$0xff] }
   0x4   :  { %2247 = vmatprep.subr.bf16.mxu0 %v2585_v0  ;;  %v2713_v20 = vld [vmem:[%s3144_s1] ss:$0 sm:$0xff]  ;;  %s2589_s1 = smov 80  }
   0x7   :  { %2248 = vmatpush3.bf16.msra.mxu0 %v2480_v2 }
   0x8   :  { %2259 = vmatprep.subr.bf16.mxu0 %v2585_v0 }
   0xa   :  { %2250 = vmatmul.mubr.msk.bf16.vlgmr.msra.gmra.mxu0 %vm88_vm1, %v69_v5 }
   0xb   :  { %2261 = vmatprep.mubr.msk.bf16.mxu0 %vm2586_vm0, %v2585_v0 }
  0xca   :  { %v126_v7 = vpop.f32.mrf.mxu0 }
  0xcb   :  { %v127_v8 = vadd.f32 %v2056_v6, %v126_v7 }
  0xcc   :  { %v2251_v9 = vpop.f32.mrf.mxu0 }
  0xcd   :  { %v2690_v10 = vpack.c.bf16 %v127_v8, %v127_v8 }
  0xce   :  { %v129_v11 = vpop.f32.mrf.mxu0 }
  0xcf   :  { %v130_v12 = vadd.f32 %v2056_v6, %v129_v11  ;;  %136 = vrot.lane.b32.xlu0 %v2690_v10, %s2587_s0 }
  0xd0   :  { %v2252_v13 = vpop.f32.mrf.mxu0 }
  0xd1   :  { %v2694_v14 = vpack.c.bf16 %v130_v12, %v130_v12 }
  0xd3   :  { %186 = vrot.lane.b32.xlu0 %v2694_v14, %s2587_s0 }
 0x141   :  { %v137_v15 = vpop.permute.xlu0 %136 }
 0x142   :  { %v143_v16 = vsel %vm138_vm2, %v137_v15, 0 }
 0x143   :  { %2254 = vmatpush3.bf16.xpose.msra.mxu1 %v143_v16 }
 0x144   :  { %2265 = vmatprep.subr.bf16.mxu1 %v2585_v0 }
 0x145   :  { %v187_v17 = vpop.permute.xlu0 %186 }
 0x146   :  { %v192_v18 = vsel %vm138_vm2, %v187_v17, 0 }
 0x147   :  { %2260 = vmatpush3.bf16.xpose.msra.mxu0 %v192_v18 }
 0x148   :  { %2271 = vmatprep.subr.bf16.mxu0 %v2585_v0 }
 0x14a   :  { %2256 = vmatmul.mubr.msk.bf16.vlgmr.msra.gmra.mxu1 %vm138_vm2, %v2690_v10 }
 0x14b   :  { %2267 = vmatprep.mubr.msk.bf16.mxu1 %vm2586_vm0, %v2585_v0 }
 0x14e   :  { %2262 = vmatmul.mubr.msk.bf16.vlgmr.msra.gmra.mxu0 %vm138_vm2, %v2694_v14 }
 0x14f   :  { %2273 = vmatprep.mubr.msk.bf16.mxu0 %vm2586_vm0, %v2585_v0 }
 0x20a   :  { %v179_v19 = vpop.f32.mrf.mxu1 }
 0x20b   :  { %v234_v21 = vmul.f32 0.25, %v179_v19 }
 0x20c   :  { %v2257_v22 = vpop.f32.mrf.mxu1 }
 0x20d   :  { %v248_v23 = vadd.f32 %v2713_v20, %v234_v21 }
 0x20e   :  { %v182_v24 = vpop.f32.mrf.mxu1  ;;  %v228_v25 = vpop.f32.mrf.mxu0 }
 0x20f   :  { %v235_v27 = vmul.f32 0.25, %v228_v25  ;;  %v251_v28 = vsel %vm250_vm3, %v248_v23, -inf }
 0x210   :  { %252 = vmax.xlane.f32.xlu1 %v251_v28  ;;  %v2258_v29 = vpop.f32.mrf.mxu1  ;;  %v2263_v30 = vpop.f32.mrf.mxu0 }
 0x211   :  { %v249_v31 = vadd.f32 %v2719_v26, %v235_v27 }
 0x212   :  { %v231_v32 = vpop.f32.mrf.mxu0 }
 0x213   :  { %v254_v33 = vsel %vm250_vm3, %v249_v31, -inf }
 0x214   :  { %255 = vmax.xlane.f32.xlu1 %v254_v33  ;;  %v2264_v34 = vpop.f32.mrf.mxu0 }
 0x225   :  { %275 = vrot.lane.b32.xlu1 %v2690_v10, %s2588_s17 }
 0x229   :  { %324 = vrot.lane.b32.xlu1 %v2694_v14, %s2588_s17 }
 0x22d   :  { %374 = vrot.lane.b32.xlu1 %v2690_v10, %s2589_s1 }
 0x299   :  { %v253_v35 = vpop.xlane.xlu1 %252 }
 0x29a   :  { %v257_v36 = vsub.f32 %v248_v23, %v253_v35 }
 0x29c   :  { %v259_v37 = vmul.f32 1.442695, %v257_v36 }
 0x29d   :  { %v256_v38 = vpop.xlane.xlu1 %255 }
 0x29e   :  { %2517 = vpow2.f32 %v259_v37  ;;  %v258_v39 = vsub.f32 %v249_v31, %v256_v38 }
 0x2a0   :  { %v261_v40 = vmul.f32 1.442695, %v258_v39 }
 0x2a1   :  { %v276_v41 = vpop.permute.xlu1 %275 }
 0x2a2   :  { %2519 = vpow2.f32 %v261_v40  ;;  %v282_v42 = vsel %vm280_vm4, %v276_v41, 0 }
 0x2a3   :  { %2266 = vmatpush3.bf16.msra.mxu1 %v282_v42 }
 0x2a4   :  { %2277 = vmatprep.subr.bf16.mxu1 %v2585_v0 }
 0x2a5   :  { %v325_v43 = vpop.permute.xlu1 %324 }
 0x2a6   :  { %v330_v44 = vsel %vm280_vm4, %v325_v43, 0 }
 0x2a7   :  { %2272 = vmatpush3.bf16.msra.mxu0 %v330_v44 }
 0x2a8   :  { %2283 = vmatprep.subr.bf16.mxu0 %v2585_v0 }
 0x2a9   :  { %v375_v49 = vpop.permute.xlu1 %374 }
 0x2aa   :  { %v380_v56 = vsel %vm138_vm2, %v375_v49, 0  ;;  %v2482_v49 = vld [vmem:[%s3145_s4] sm:$0xff]  }
 0x2ab   :  { %v2518_v45 = vpop.eup %2517 }
 0x2ac   :  { %v263_v46 = vsel %vm250_vm3, %v2518_v45, 0.0 }
 0x2ad   :  { %264 = vadd.xlane.f32.xlu0 %v263_v46 }
 0x2af   :  { %v2520_v47 = vpop.eup %2519 }
 0x2b0   :  { %v266_v48 = vsel %vm250_vm3, %v2520_v47, 0.0 }
 0x2b1   :  { %267 = vadd.xlane.f32.xlu1 %v266_v48  ;;  %v2481_v48 = vld [vmem:[%s3145_s4 + $0x8] sm:$0xff]  }
 0x2c2   :  { %424 = vrot.lane.b32.xlu1 %v2694_v14, %s2589_s1 }
 0x2c3   :  { %372 = vrot.lane.b32.xlu0 %v2690_v10, %s2590_s18 }
 0x2c6   :  { %422 = vrot.lane.b32.xlu1 %v2694_v14, %s2590_s18 }
 0x336   :  { %v265_v50 = vpop.xlane.xlu0 %264 }
 0x337   :  { %2521 = vrcp.f32 %v265_v50 }
 0x33a   :  { %v268_v51 = vpop.xlane.xlu1 %267  ;;  %v373_v61 = vpop.permute.xlu0 %372 }
 0x33b   :  { %2523 = vrcp.f32 %v268_v51 }
 0x33e   :  { %v425_v58 = vpop.permute.xlu1 %424 }
 0x33f   :  { %v430_v60 = vsel %vm138_vm2, %v425_v58, 0 }
 0x342   :  { %v423_v62 = vpop.permute.xlu1 %422 }
 0x344   :  { %v2522_v52 = vpop.eup %2521 }
 0x345   :  { %v271_v53 = vmul.f32 %v2522_v52, %v2518_v45 }
 0x347   :  { %v273_v54 = vpack.c.bf16 %v271_v53, %v271_v53 }
 0x348   :  { %v2524_v55 = vpop.eup %2523 }
 0x349   :  { %2268 = vmatmul.mubr.msk.bf16.vlgmr.msra.gmra.mxu1 %vm250_vm3, %v273_v54  ;;  %v272_v57 = vmul.f32 %v2524_v55, %v2520_v47 }
 0x34a   :  { %2278 = vmatpush3.bf16.xpose.msra.mxu1 %v380_v56  ;;  %2279 = vmatprep.mubr.msk.bf16.mxu1 %vm2586_vm0, %v2585_v0 }
 0x34b   :  { %v274_v59 = vpack.c.bf16 %v272_v57, %v272_v57  ;;  %2289 = vmatprep.subr.bf16.mxu1 %v2585_v0 }
 0x34d   :  { %2274 = vmatmul.mubr.msk.bf16.vlgmr.msra.gmra.mxu0 %vm250_vm3, %v274_v59 }
 0x34e   :  { %2284 = vmatpush3.bf16.xpose.msra.mxu0 %v430_v60  ;;  %2285 = vmatprep.mubr.msk.bf16.mxu0 %vm2586_vm0, %v2585_v0 }
 0x34f   :  { %2295 = vmatprep.subr.bf16.mxu0 %v2585_v0 }
 0x351   :  { %2280 = vmatmul.mubr.msk.bf16.vlgmr.msra.gmra.mxu1 %vm138_vm2, %v373_v61 }
 0x352   :  { %2291 = vmatprep.mubr.msk.bf16.mxu1 %vm2586_vm0, %v2585_v0 }
 0x355   :  { %2286 = vmatmul.mubr.msk.bf16.vlgmr.msra.gmra.mxu0 %vm138_vm2, %v423_v62 }
 0x356   :  { %2297 = vmatprep.mubr.msk.bf16.mxu0 %vm2586_vm0, %v2585_v0 }
 0x409   :  { %v2758_v63 = vpop.f32.mrf.mxu1 }
 0x40b   :  { %v2269_v1 = vpop.f32.mrf.mxu1 }
 0x40d   :  { %v321_v2 = vpop.f32.mrf.mxu1  ;;  %v2760_v5 = vpop.f32.mrf.mxu0 }
 0x40f   :  { %v2270_v6 = vpop.f32.mrf.mxu1  ;;  %v2275_v7 = vpop.f32.mrf.mxu0 }
 0x410   :  { %v607_v6 = vlaneseq }
 0x411   :  { %v369_v8 = vpop.f32.mrf.mxu0  ;;  %v416_v9 = vpop.f32.mrf.mxu1 }
 0x412   :  { %v472_v11 = vmul.f32 0.25, %v416_v9  ;;  %v2798_v7 = vshrl.u32 %v607_v6, 7  ;;  %v2806_v9 = vld [vmem:[%s3146_s7] sm:$0x3f] }
 0x413   :  { %v2276_v12 = vpop.f32.mrf.mxu0  ;;  %v2281_v13 = vpop.f32.mrf.mxu1 }
 0x414   :  { %v474_v15 = vadd.f32 %v2713_v20, %v472_v11  ;;  %v2801_v8 = vsub.s32 0, %v2798_v7 }
 0x415   :  { %v419_v16 = vpop.f32.mrf.mxu1  ;;  %v466_v17 = vpop.f32.mrf.mxu0 }
 0x416   :  { %v473_v18 = vmul.f32 0.25, %v466_v17  ;;  %v476_v19 = vsel %vm250_vm3, %v474_v15, -inf }
 0x417   :  { %477 = vmax.xlane.f32.xlu1 %v476_v19  ;;  %v2282_v21 = vpop.f32.mrf.mxu1  ;;  %v2287_v22 = vpop.f32.mrf.mxu0 }
 0x418   :  { %v475_v23 = vadd.f32 %v2719_v26, %v473_v18 }
 0x419   :  { %v469_v24 = vpop.f32.mrf.mxu0 }
 0x41a   :  { %v479_v25 = vsel %vm250_vm3, %v475_v23, -inf }
 0x41b   :  { %480 = vmax.xlane.f32.xlu0 %v479_v25  ;;  %v2288_v27 = vpop.f32.mrf.mxu0 }
 0x431   :  { %548 = vrot.lane.b32.xlu0 %v2694_v14, %s2591_s19 }
 0x4a0   :  { %v478_v28 = vpop.xlane.xlu1 %477 }
 0x4a1   :  { %v482_v29 = vsub.f32 %v474_v15, %v478_v28 }
 0x4a3   :  { %v484_v30 = vmul.f32 1.442695, %v482_v29 }
 0x4a4   :  { %v481_v31 = vpop.xlane.xlu0 %480 }
 0x4a5   :  { %2525 = vpow2.f32 %v484_v30  ;;  %v483_v32 = vsub.f32 %v475_v23, %v481_v31 }
 0x4a7   :  { %v486_v33 = vmul.f32 1.442695, %v483_v32  ;;  %v2484_v32 = vld [vmem:[%s3147_s5] sm:$0xff]  }
 0x4a8   :  { %v549_v34 = vpop.permute.xlu0 %548 }
 0x4a9   :  { %2527 = vpow2.f32 %v486_v33  ;;  %v554_v35 = vsel %vm280_vm4, %v549_v34, 0 }
 0x4aa   :  { %2296 = vmatpush3.bf16.msra.mxu0 %v554_v35 }
 0x4ab   :  { %2309 = vmatprep.subr.bf16.mxu0 %v2585_v0 }
 0x4b2   :  { %v2526_v36 = vpop.eup %2525 }
 0x4b3   :  { %v488_v37 = vsel %vm250_vm3, %v2526_v36, 0.0 }
 0x4b4   :  { %489 = vadd.xlane.f32.xlu1 %v488_v37 }
 0x4b6   :  { %v2528_v38 = vpop.eup %2527 }
 0x4b7   :  { %v491_v14 = vsel %vm250_vm3, %v2528_v38, 0.0 }
 0x4b8   :  { %492 = vadd.xlane.f32.xlu1 %v491_v14  ;;  %v2825_v14 = vsub.s32 2, %v2798_v7 }
 0x4c9   :  { %500 = vrot.lane.b32.xlu1 %v2690_v10, %s2591_s19 }
 0x53d   :  { %v490_v39 = vpop.xlane.xlu1 %489 }
 0x53e   :  { %2529 = vrcp.f32 %v490_v39 }
 0x541   :  { %v493_v40 = vpop.xlane.xlu1 %492 }
 0x542   :  { %2531 = vrcp.f32 %v493_v40 }
 0x545   :  { %v501_v41 = vpop.permute.xlu1 %500 }
 0x546   :  { %v506_v42 = vsel %vm280_vm4, %v501_v41, 0  ;;  %v699_v41 = vrot.slane %v2806_v9, %v2825_v14 }
 0x547   :  { %2290 = vmatpush3.bf16.msra.mxu1 %v506_v42  ;;  %v704_v42 = vsub.s32 3, %v2798_v7 }
 0x548   :  { %2301 = vmatprep.subr.bf16.mxu1 %v2585_v0 }
 0x54b   :  { %v2530_v43 = vpop.eup %2529 }
 0x54c   :  { %v496_v44 = vmul.f32 %v2530_v43, %v2526_v36 }
 0x54e   :  { %v498_v45 = vpack.c.bf16 %v496_v44, %v496_v44 }
 0x54f   :  { %v2532_v46 = vpop.eup %2531 }
 0x550   :  { %2292 = vmatmul.mubr.msk.bf16.vlgmr.msra.gmra.mxu1 %vm250_vm3, %v498_v45  ;;  %v497_v47 = vmul.f32 %v2532_v46, %v2528_v38  ;;  %v705_v46 = vrot.slane %v2806_v9, %v704_v42 }
 0x551   :  { %2305 = vmatprep.mubr.msk.bf16.mxu1 %vm2586_vm0, %v2585_v0  ;;  %2302 = vmatpush3.bf16.msra.mxu1 %v2481_v48 }
 0x552   :  { %v499_v10 = vpack.c.bf16 %v497_v47, %v497_v47  ;;  %2303 = vmatprep.subr.bf16.mxu1 %v2585_v0 }
 0x554   :  { %2298 = vmatmul.mubr.msk.bf16.vlgmr.msra.gmra.mxu0 %vm250_vm3, %v499_v10 }
 0x555   :  { %2313 = vmatprep.mubr.msk.bf16.mxu0 %vm2586_vm0, %v2585_v0  ;;  %2304 = vmatpush3.bf16.msra.mxu1 %v2482_v49 }
 0x556   :  { %2317 = vmatprep.subr.bf16.mxu1 %v2585_v0 }
 0x610   :  { %v542_v50 = vpop.f32.mrf.mxu1 }
 0x612   :  { %v2293_v51 = vpop.f32.mrf.mxu1 }
 0x613   :  { %v2486_v51 = vld [vmem:[%s3148_s6 + $0x10] sm:$0xff]  }
 0x614   :  { %v545_v52 = vpop.f32.mrf.mxu1  ;;  %v590_v53 = vpop.f32.mrf.mxu0 }
 0x615   :  { %v2469_v54 = vpack.i.bf16 %v590_v53, %v542_v50  ;;  %v2485_v50 = vld [vmem:[%s3148_s6 + $0x18] sm:$0xff]   ;;  %v2487_v52 = vld [vmem:[%s3148_s6 + $0x8] sm:$0xff]   ;;  %v2488_v53 = vld [vmem:[%s3148_s6] sm:$0xff]  }
 0x616   :  { %v2294_v55 = vpop.f32.mrf.mxu1  ;;  %v2299_v56 = vpop.f32.mrf.mxu0 }
 0x617   :  { %2470 = vrot.lane.b32.xlu1 %v2469_v54, %s2592_s24  ;;  %v2073_v54 = vld [vmem:[%s3149_s8] ss:$0 sm:$0xff] }
 0x618   :  { %v593_v57 = vpop.f32.mrf.mxu0 }
 0x61a   :  { %v2300_v58 = vpop.f32.mrf.mxu0 }
 0x689   :  { %v2471_v59 = vpop.permute.xlu1 %2470 }
 0x68a   :  { %v2473_v60 = vunpack.i.h.bf16 %v2471_v59  ;;  %v2472_v61 = vunpack.i.l.bf16 %v2471_v59 }
 0x68c   :  { %v605_v62 = vsel %vm138_vm2, %v2760_v5, %v2473_v60  ;;  %v604_v1 = vsel %vm138_vm2, %v2758_v63, %v2472_v61  ;;  %v610_v63 = vrot.slane %v2806_v9, %v2801_v8 }
 0x68d   :  { %v606_v2 = vpack.c.bf16 %v605_v62, %v604_v1 }
 0x68f   :  { %2306 = vmatmul.mubr.msk.bf16.vlgmr.msra.gmra.mxu1 %vm88_vm1, %v606_v2 }
 0x690   :  { %2325 = vmatprep.mubr.msk.bf16.mxu1 %vm2586_vm0, %v2585_v0  ;;  %2318 = vmatpush3.bf16.msra.mxu1 %v2485_v50 }
 0x691   :  { %2319 = vmatprep.subr.bf16.mxu1 %v2585_v0 }
 0x694   :  { %2320 = vmatpush3.bf16.msra.mxu1 %v2486_v51 }
 0x695   :  { %2321 = vmatprep.subr.bf16.mxu1 %v2585_v0 }
 0x698   :  { %2322 = vmatpush3.bf16.msra.mxu1 %v2487_v52 }
 0x699   :  { %2323 = vmatprep.subr.bf16.mxu1 %v2585_v0 }
 0x69c   :  { %2324 = vmatpush3.bf16.msra.mxu1 %v2488_v53 }
 0x69d   :  { %2343 = vmatprep.subr.bf16.mxu1 %v2585_v0 }
 0x74f   :  { %v660_v5 = vpop.f32.mrf.mxu1 }
 0x750   :  { %v661_v11 = vadd.f32 %v660_v5, %v610_v63 }
 0x751   :  { %v2307_v12 = vpop.f32.mrf.mxu1 }
 0x752   :  { %v667_v13 = vadd.f32 %v661_v11, %v2673_v3 }
 0x753   :  { %v663_v15 = vpop.f32.mrf.mxu1 }
 0x754   :  { %v664_v16 = vadd.f32 %v663_v15, %v610_v63  ;;  %v669_v17 = vsel %vm88_vm1, %v667_v13, 0.0 }
 0x755   :  { %670 = vadd.xlane.f32.xlu1 %v669_v17  ;;  %v2308_v18 = vpop.f32.mrf.mxu1 }
 0x756   :  { %v668_v19 = vadd.f32 %v664_v16, %v2678_v4  ;;  %v2483_v4 = vld [vmem:[%s3147_s5 + $0x8] sm:$0xff]  }
 0x757   :  { %2310 = vmatpush3.bf16.msra.mxu0 %v2483_v4 }
 0x758   :  { %v672_v21 = vsel %vm88_vm1, %v668_v19, 0.0  ;;  %2311 = vmatprep.subr.bf16.mxu0 %v2585_v0 }
 0x759   :  { %673 = vadd.xlane.f32.xlu0 %v672_v21 }
 0x75b   :  { %2312 = vmatpush3.bf16.msra.mxu0 %v2484_v32 }
 0x75c   :  { %2329 = vmatprep.subr.bf16.mxu0 %v2585_v0 }
 0x7de   :  { %v671_v22 = vpop.xlane.xlu1 %670 }
 0x7df   :  { %v676_v23 = vmul.f32 0.03125, %v671_v22 }
 0x7e1   :  { %v678_v24 = vsub.f32 %v667_v13, %v676_v23 }
 0x7e2   :  { %v674_v25 = vpop.xlane.xlu0 %673 }
 0x7e3   :  { %v677_v27 = vmul.f32 0.03125, %v674_v25  ;;  %v680_v28 = vmul.f32 %v678_v24, %v678_v24  ;;  %v2859_v25 = vsub.s32 1, %v2798_v7 }
 0x7e5   :  { %v679_v29 = vsub.f32 %v668_v19, %v677_v27  ;;  %v682_v3 = vsel %vm88_vm1, %v680_v28, 0.0  ;;  %v793_v27 = vrot.slane %v2806_v9, %v2859_v25 }
 0x7e6   :  { %683 = vadd.xlane.f32.xlu0 %v682_v3 }
 0x7e7   :  { %v681_v30 = vmul.f32 %v679_v29, %v679_v29 }
 0x7e9   :  { %v685_v31 = vsel %vm88_vm1, %v681_v30, 0.0 }
 0x7ea   :  { %686 = vadd.xlane.f32.xlu1 %v685_v31 }
 0x86f   :  { %v684_v33 = vpop.xlane.xlu0 %683 }
 0x870   :  { %v688_v34 = vmul.f32 0.03125, %v684_v33 }
 0x872   :  { %v690_v35 = vadd.f32 1e-12, %v688_v34 }
 0x873   :  { %v687_v36 = vpop.xlane.xlu1 %686 }
 0x874   :  { %2533 = vrsqrt.f32 %v690_v35  ;;  %v689_v37 = vmul.f32 0.03125, %v687_v36 }
 0x876   :  { %v691_v38 = vadd.f32 1e-12, %v689_v37 }
 0x878   :  { %2535 = vrsqrt.f32 %v691_v38 }
 0x881   :  { %v2534_v39 = vpop.eup %2533 }
 0x882   :  { %v694_v40 = vmul.f32 %v2534_v39, %v678_v24 }
 0x884   :  { %v700_v45 = vmul.f32 %v699_v41, %v694_v40 }
 0x885   :  { %v2536_v43 = vpop.eup %2535 }
 0x886   :  { %v695_v44 = vmul.f32 %v2536_v43, %v679_v29  ;;  %v706_v10 = vadd.f32 %v705_v46, %v700_v45 }
 0x888   :  { %v701_v47 = vmul.f32 %v699_v41, %v695_v44 }
 0x88a   :  { %v707_v48 = vadd.f32 %v705_v46, %v701_v47  ;;  %v2489_v47 = vld [vmem:[%s3141_s2 + $0x18] sm:$0xff]  }
 0x88c   :  { %v708_v49 = vpack.c.bf16 %v707_v48, %v706_v10 }
 0x88e   :  { %2314 = vmatmul.mubr.msk.bf16.vlgmr.msra.gmra.mxu0 %vm88_vm1, %v708_v49 }
 0x88f   :  { %2333 = vmatprep.mubr.msk.bf16.mxu0 %vm2586_vm0, %v2585_v0  ;;  %2330 = vmatpush3.bf16.msra.mxu0 %v2489_v47 }
 0x890   :  { %2331 = vmatprep.subr.bf16.mxu0 %v2585_v0 }
 0x94e   :  { %v764_v55 = vpop.f32.mrf.mxu0 }
 0x94f   :  { %v765_v56 = vadd.f32 %v2073_v54, %v764_v55 }
 0x950   :  { %v2315_v57 = vpop.f32.mrf.mxu0 }
 0x951   :  { %v773_v58 = vmul.f32 0.044715, %v765_v56  ;;  %v771_v18 = vmul.f32 0.5, %v765_v56 }
 0x952   :  { %v767_v59 = vpop.f32.mrf.mxu0 }
 0x953   :  { %v775_v60 = vmul.f32 %v773_v58, %v765_v56  ;;  %v768_v61 = vadd.f32 %v2073_v54, %v767_v59  ;;  %v893_v54 = vsub.s32 4, %v2798_v7  ;;  %v899_v58 = vsub.s32 5, %v2798_v7  ;;  %v2503_v7 = vld [vmem:[%s3151_s10 + $0x28] sm:$0xff]  }
 0x954   :  { %v2316_v62 = vpop.f32.mrf.mxu0 }
 0x955   :  { %v777_v1 = vmul.f32 %v775_v60, %v765_v56  ;;  %v774_v2 = vmul.f32 0.044715, %v768_v61  ;;  %v772_v19 = vmul.f32 0.5, %v768_v61  ;;  %v894_v57 = vrot.slane %v2806_v9, %v893_v54 }
 0x956   :  { %v900_v62 = vrot.slane %v2806_v9, %v899_v58 }
 0x957   :  { %v779_v6 = vadd.f32 %v777_v1, %v765_v56  ;;  %v776_v63 = vmul.f32 %v774_v2, %v768_v61 }
 0x959   :  { %v781_v5 = vmul.f32 0.7978846, %v779_v6  ;;  %v778_v11 = vmul.f32 %v776_v63, %v768_v61 }
 0x95b   :  { %2537 = vtanh.f32 %v781_v5  ;;  %v780_v12 = vadd.f32 %v778_v11, %v768_v61  ;;  %v2105_v5 = vld [vmem:[%s3143_s3 + $0x1] ss:$0 sm:$0xff] }
 0x95d   :  { %v782_v13 = vmul.f32 0.7978846, %v780_v12 }
 0x95f   :  { %2539 = vtanh.f32 %v782_v13 }
 0x968   :  { %v2538_v15 = vpop.eup %2537 }
 0x969   :  { %v785_v16 = vadd.f32 1.0, %v2538_v15 }
 0x96b   :  { %v787_v22 = vmul.f32 %v785_v16, %v771_v18 }
 0x96c   :  { %v2540_v17 = vpop.eup %2539 }
 0x96d   :  { %v786_v21 = vadd.f32 1.0, %v2540_v17 }
 0x96f   :  { %v788_v23 = vmul.f32 %v786_v21, %v772_v19 }
 0x971   :  { %v789_v24 = vpack.c.bf16 %v788_v23, %v787_v22 }
 0x973   :  { %2326 = vmatmul.mubr.msk.bf16.vlgmr.msra.gmra.mxu1 %vm818_vm5, %v789_v24 }
 0x974   :  { %2345 = vmatprep.mubr.msk.bf16.mxu1 %vm2586_vm0, %v2585_v0 }
 0xa33   :  { %v856_v28 = vpop.f32.mrf.mxu1 }
 0xa34   :  { %v857_v29 = vadd.f32 %v856_v28, %v793_v27 }
 0xa35   :  { %v2327_v3 = vpop.f32.mrf.mxu1 }
 0xa36   :  { %v863_v30 = vadd.f32 %v857_v29, %v706_v10  ;;  %v2490_v10 = vld [vmem:[%s3141_s2 + $0x10] sm:$0xff]  }
 0xa37   :  { %v859_v31 = vpop.f32.mrf.mxu1  ;;  %2332 = vmatpush3.bf16.msra.mxu0 %v2490_v10 }
 0xa38   :  { %v860_v4 = vadd.f32 %v859_v31, %v793_v27  ;;  %v865_v32 = vsel %vm88_vm1, %v863_v30, 0.0  ;;  %2337 = vmatprep.subr.bf16.mxu0 %v2585_v0 }
 0xa39   :  { %866 = vadd.xlane.f32.xlu0 %v865_v32  ;;  %v2328_v33 = vpop.f32.mrf.mxu1 }
 0xa3a   :  { %v864_v34 = vadd.f32 %v860_v4, %v707_v48 }
 0xa3c   :  { %v868_v35 = vsel %vm88_vm1, %v864_v34, 0.0 }
 0xa3d   :  { %869 = vadd.xlane.f32.xlu1 %v868_v35 }
 0xac2   :  { %v867_v36 = vpop.xlane.xlu0 %866 }
 0xac3   :  { %v871_v37 = vmul.f32 0.03125, %v867_v36 }
 0xac5   :  { %v873_v38 = vsub.f32 %v863_v30, %v871_v37 }
 0xac6   :  { %v870_v39 = vpop.xlane.xlu1 %869 }
 0xac7   :  { %v872_v40 = vmul.f32 0.03125, %v870_v39  ;;  %v875_v41 = vmul.f32 %v873_v38, %v873_v38 }
 0xac9   :  { %v874_v43 = vsub.f32 %v864_v34, %v872_v40  ;;  %v877_v44 = vsel %vm88_vm1, %v875_v41, 0.0 }
 0xaca   :  { %878 = vadd.xlane.f32.xlu0 %v877_v44 }
 0xacb   :  { %v876_v45 = vmul.f32 %v874_v43, %v874_v43 }
 0xacd   :  { %v880_v46 = vsel %vm88_vm1, %v876_v45, 0.0 }
 0xace   :  { %881 = vadd.xlane.f32.xlu1 %v880_v46 }
 0xb53   :  { %v879_v48 = vpop.xlane.xlu0 %878 }
 0xb54   :  { %v883_v49 = vmul.f32 0.03125, %v879_v48 }
 0xb56   :  { %v885_v50 = vadd.f32 1e-12, %v883_v49 }
 0xb57   :  { %v882_v51 = vpop.xlane.xlu1 %881 }
 0xb58   :  { %2541 = vrsqrt.f32 %v885_v50  ;;  %v884_v52 = vmul.f32 0.03125, %v882_v51 }
 0xb5a   :  { %v886_v53 = vadd.f32 1e-12, %v884_v52 }
 0xb5c   :  { %2543 = vrsqrt.f32 %v886_v53 }
 0xb65   :  { %v2542_v55 = vpop.eup %2541 }
 0xb66   :  { %v889_v56 = vmul.f32 %v2542_v55, %v873_v38 }
 0xb68   :  { %v895_v61 = vmul.f32 %v894_v57, %v889_v56 }
 0xb69   :  { %v2544_v59 = vpop.eup %2543 }
 0xb6a   :  { %v890_v60 = vmul.f32 %v2544_v59, %v874_v43  ;;  %v2883_v2 = vadd.f32 %v900_v62, %v895_v61 }
 0xb6c   :  { %v896_v1 = vmul.f32 %v894_v57, %v890_v60 }
 0xb6e   :  { %v2885_v6 = vadd.f32 %v900_v62, %v896_v1 }
 0xb70   :  { %v933_v63 = vpack.c.bf16 %v2885_v6, %v2883_v2 }
 0xb72   :  { %2334 = vmatmul.mubr.msk.bf16.vlgmr.msra.gmra.mxu0 %vm88_vm1, %v933_v63 }
 0xb73   :  { %2339 = vmatprep.mubr.msk.bf16.mxu0 %vm2586_vm0, %v2585_v0 }
 0xc32   :  { %v989_v11 = vpop.f32.mrf.mxu0 }
 0xc33   :  { %v990_v12 = vadd.f32 %v2105_v5, %v989_v11 }
 0xc34   :  { %v2335_v9 = vpop.f32.mrf.mxu0 }
 0xc35   :  { %v2895_v13 = vpack.c.bf16 %v990_v12, %v990_v12 }
 0xc36   :  { %v992_v15 = vpop.f32.mrf.mxu0 }
 0xc37   :  { %v993_v16 = vadd.f32 %v2105_v5, %v992_v15  ;;  %999 = vrot.lane.b32.xlu0 %v2895_v13, %s2587_s0 }
 0xc38   :  { %v2336_v17 = vpop.f32.mrf.mxu0 }
 0xc39   :  { %v2899_v18 = vpack.c.bf16 %v993_v16, %v993_v16 }
 0xc3b   :  { %1048 = vrot.lane.b32.xlu1 %v2899_v18, %s2587_s0 }
 0xca9   :  { %v1000_v19 = vpop.permute.xlu0 %999 }
 0xcaa   :  { %v1005_v21 = vsel %vm138_vm2, %v1000_v19, 0 }
 0xcab   :  { %2338 = vmatpush3.bf16.xpose.msra.mxu0 %v1005_v21 }
 0xcac   :  { %2349 = vmatprep.subr.bf16.mxu0 %v2585_v0 }
 0xcad   :  { %v1049_v22 = vpop.permute.xlu1 %1048 }
 0xcae   :  { %v1054_v23 = vsel %vm138_vm2, %v1049_v22, 0 }
 0xcaf   :  { %2344 = vmatpush3.bf16.xpose.msra.mxu1 %v1054_v23 }
 0xcb0   :  { %2355 = vmatprep.subr.bf16.mxu1 %v2585_v0 }
 0xcb2   :  { %2340 = vmatmul.mubr.msk.bf16.vlgmr.msra.gmra.mxu0 %vm138_vm2, %v2895_v13 }
 0xcb3   :  { %2351 = vmatprep.mubr.msk.bf16.mxu0 %vm2586_vm0, %v2585_v0 }
 0xcb6   :  { %2346 = vmatmul.mubr.msk.bf16.vlgmr.msra.gmra.mxu1 %vm138_vm2, %v2899_v18 }
 0xcb7   :  { %2357 = vmatprep.mubr.msk.bf16.mxu1 %vm2586_vm0, %v2585_v0 }
 0xd72   :  { %v1041_v24 = vpop.f32.mrf.mxu0 }
 0xd73   :  { %v1096_v27 = vmul.f32 0.25, %v1041_v24 }
 0xd74   :  { %v2341_v28 = vpop.f32.mrf.mxu0 }
 0xd75   :  { %v1098_v29 = vadd.f32 %v2713_v20, %v1096_v27 }
 0xd76   :  { %v1044_v3 = vpop.f32.mrf.mxu0  ;;  %v1090_v30 = vpop.f32.mrf.mxu1 }
 0xd77   :  { %v1097_v31 = vmul.f32 0.25, %v1090_v30  ;;  %v1100_v4 = vsel %vm250_vm3, %v1098_v29, -inf }
 0xd78   :  { %v2347_v32 = vpop.f32.mrf.mxu1  ;;  %1101 = vmax.xlane.f32.xlu1 %v1100_v4  ;;  %v2342_v33 = vpop.f32.mrf.mxu0 }
 0xd79   :  { %v1099_v34 = vadd.f32 %v2719_v26, %v1097_v31 }
 0xd7a   :  { %v1093_v35 = vpop.f32.mrf.mxu1 }
 0xd7b   :  { %v1103_v36 = vsel %vm250_vm3, %v1099_v34, -inf }
 0xd7c   :  { %1104 = vmax.xlane.f32.xlu0 %v1103_v36  ;;  %v2348_v37 = vpop.f32.mrf.mxu1 }
 0xd89   :  { %1172 = vrot.lane.b32.xlu1 %v2899_v18, %s2588_s17 }
 0xd92   :  { %1124 = vrot.lane.b32.xlu0 %v2895_v13, %s2588_s17 }
 0xe01   :  { %v1102_v38 = vpop.xlane.xlu1 %1101 }
 0xe02   :  { %v1106_v39 = vsub.f32 %v1098_v29, %v1102_v38 }
 0xe04   :  { %v1108_v40 = vmul.f32 1.442695, %v1106_v39 }
 0xe05   :  { %v1105_v41 = vpop.xlane.xlu0 %1104  ;;  %v1173_v43 = vpop.permute.xlu1 %1172 }
 0xe06   :  { %2545 = vpow2.f32 %v1108_v40  ;;  %v1107_v44 = vsub.f32 %v1099_v34, %v1105_v41  ;;  %v1178_v45 = vsel %vm280_vm4, %v1173_v43, 0 }
 0xe07   :  { %2356 = vmatpush3.bf16.msra.mxu1 %v1178_v45 }
 0xe08   :  { %v1110_v46 = vmul.f32 1.442695, %v1107_v44  ;;  %2367 = vmatprep.subr.bf16.mxu1 %v2585_v0 }
 0xe09   :  { %v1125_v47 = vpop.permute.xlu0 %1124 }
 0xe0a   :  { %2547 = vpow2.f32 %v1110_v46  ;;  %v1130_v10 = vsel %vm280_vm4, %v1125_v47, 0 }
 0xe0b   :  { %2350 = vmatpush3.bf16.msra.mxu0 %v1130_v10 }
 0xe0c   :  { %2361 = vmatprep.subr.bf16.mxu0 %v2585_v0 }
 0xe13   :  { %v2546_v48 = vpop.eup %2545 }
 0xe14   :  { %v1112_v49 = vsel %vm250_vm3, %v2546_v48, 0.0 }
 0xe15   :  { %1113 = vadd.xlane.f32.xlu0 %v1112_v49 }
 0xe17   :  { %v2548_v50 = vpop.eup %2547 }
 0xe18   :  { %v1115_v51 = vsel %vm250_vm3, %v2548_v50, 0.0 }
 0xe19   :  { %1116 = vadd.xlane.f32.xlu1 %v1115_v51 }
 0xe2a   :  { %1222 = vrot.lane.b32.xlu1 %v2895_v13, %s2589_s1 }
 0xe2b   :  { %1272 = vrot.lane.b32.xlu0 %v2899_v18, %s2589_s1 }
 0xe2e   :  { %1220 = vrot.lane.b32.xlu1 %v2895_v13, %s2590_s18 }
 0xe2f   :  { %1270 = vrot.lane.b32.xlu0 %v2899_v18, %s2590_s18 }
 0xe9e   :  { %v1114_v52 = vpop.xlane.xlu0 %1113 }
 0xe9f   :  { %2549 = vrcp.f32 %v1114_v52 }
 0xea2   :  { %v1117_v53 = vpop.xlane.xlu1 %1116  ;;  %v1273_v1 = vpop.permute.xlu0 %1272 }
 0xea3   :  { %2551 = vrcp.f32 %v1117_v53  ;;  %v1278_v5 = vsel %vm138_vm2, %v1273_v1, 0 }
 0xea6   :  { %v1223_v57 = vpop.permute.xlu1 %1222  ;;  %v1271_v12 = vpop.permute.xlu0 %1270 }
 0xea7   :  { %v1228_v61 = vsel %vm138_vm2, %v1223_v57, 0  ;;  %v2491_v57 = vld [vmem:[%s3145_s4 + $0x18] sm:$0xff]  }
 0xeaa   :  { %v1221_v11 = vpop.permute.xlu1 %1220 }
 0xeac   :  { %v2550_v55 = vpop.eup %2549 }
 0xead   :  { %v1120_v56 = vmul.f32 %v2550_v55, %v2546_v48 }
 0xeaf   :  { %v1122_v59 = vpack.c.bf16 %v1120_v56, %v1120_v56 }
 0xeb0   :  { %v2552_v60 = vpop.eup %2551 }
 0xeb1   :  { %2352 = vmatmul.mubr.msk.bf16.vlgmr.msra.gmra.mxu0 %vm250_vm3, %v1122_v59  ;;  %v1121_v62 = vmul.f32 %v2552_v60, %v2548_v50  ;;  %v2492_v59 = vld [vmem:[%s3145_s4 + $0x10] sm:$0xff]  }
 0xeb2   :  { %2362 = vmatpush3.bf16.xpose.msra.mxu0 %v1228_v61  ;;  %2363 = vmatprep.mubr.msk.bf16.mxu0 %vm2586_vm0, %v2585_v0 }
 0xeb3   :  { %v1123_v63 = vpack.c.bf16 %v1121_v62, %v1121_v62  ;;  %2373 = vmatprep.subr.bf16.mxu0 %v2585_v0 }
 0xeb5   :  { %2358 = vmatmul.mubr.msk.bf16.vlgmr.msra.gmra.mxu1 %vm250_vm3, %v1123_v63 }
 0xeb6   :  { %2368 = vmatpush3.bf16.xpose.msra.mxu1 %v1278_v5  ;;  %2369 = vmatprep.mubr.msk.bf16.mxu1 %vm2586_vm0, %v2585_v0 }
 0xeb7   :  { %2379 = vmatprep.subr.bf16.mxu1 %v2585_v0 }
 0xeb9   :  { %2364 = vmatmul.mubr.msk.bf16.vlgmr.msra.gmra.mxu0 %vm138_vm2, %v1221_v11 }
 0xeba   :  { %2375 = vmatprep.mubr.msk.bf16.mxu0 %vm2586_vm0, %v2585_v0 }
 0xebd   :  { %2370 = vmatmul.mubr.msk.bf16.vlgmr.msra.gmra.mxu1 %vm138_vm2, %v1271_v12 }
 0xebe   :  { %2381 = vmatprep.mubr.msk.bf16.mxu1 %vm2586_vm0, %v2585_v0 }
 0xf71   :  { %v2953_v9 = vpop.f32.mrf.mxu0 }
 0xf73   :  { %v2353_v15 = vpop.f32.mrf.mxu0 }
 0xf75   :  { %v1169_v16 = vpop.f32.mrf.mxu0  ;;  %v2955_v17 = vpop.f32.mrf.mxu1 }
 0xf77   :  { %v2354_v19 = vpop.f32.mrf.mxu0  ;;  %v2359_v21 = vpop.f32.mrf.mxu1 }
 0xf79   :  { %v1217_v22 = vpop.f32.mrf.mxu1  ;;  %v1264_v23 = vpop.f32.mrf.mxu0 }
 0xf7a   :  { %v1320_v24 = vmul.f32 0.25, %v1264_v23 }
 0xf7b   :  { %v2360_v27 = vpop.f32.mrf.mxu1  ;;  %v2365_v28 = vpop.f32.mrf.mxu0 }
 0xf7c   :  { %v1322_v29 = vadd.f32 %v2713_v20, %v1320_v24  ;;  %v2996_v27 = vld [vmem:[%s3146_s7 + $0x8] sm:$0x3f] }
 0xf7d   :  { %v1267_v3 = vpop.f32.mrf.mxu0  ;;  %v1314_v30 = vpop.f32.mrf.mxu1  ;;  %v1458_v28 = vrot.slane %v2996_v27, %v2801_v8 }
 0xf7e   :  { %v1321_v31 = vmul.f32 0.25, %v1314_v30  ;;  %v1324_v4 = vsel %vm250_vm3, %v1322_v29, -inf }
 0xf7f   :  { %v2371_v32 = vpop.f32.mrf.mxu1  ;;  %1325 = vmax.xlane.f32.xlu1 %v1324_v4  ;;  %v2366_v33 = vpop.f32.mrf.mxu0 }
 0xf80   :  { %v1323_v34 = vadd.f32 %v2719_v26, %v1321_v31 }
 0xf81   :  { %v1317_v35 = vpop.f32.mrf.mxu1 }
 0xf82   :  { %v1327_v36 = vsel %vm250_vm3, %v1323_v34, -inf }
 0xf83   :  { %1328 = vmax.xlane.f32.xlu0 %v1327_v36  ;;  %v2372_v37 = vpop.f32.mrf.mxu1 }
0x1008   :  { %v1326_v38 = vpop.xlane.xlu1 %1325 }
0x1009   :  { %v1330_v39 = vsub.f32 %v1322_v29, %v1326_v38 }
0x100b   :  { %v1332_v40 = vmul.f32 1.442695, %v1330_v39 }
0x100c   :  { %v1329_v41 = vpop.xlane.xlu0 %1328 }
0x100d   :  { %2553 = vpow2.f32 %v1332_v40  ;;  %v1331_v20 = vsub.f32 %v1323_v34, %v1329_v41 }
0x100f   :  { %v1334_v43 = vmul.f32 1.442695, %v1331_v20 }
0x1011   :  { %2555 = vpow2.f32 %v1334_v43 }
0x101a   :  { %v2554_v44 = vpop.eup %2553 }
0x101b   :  { %v1336_v45 = vsel %vm250_vm3, %v2554_v44, 0.0 }
0x101c   :  { %1337 = vadd.xlane.f32.xlu0 %v1336_v45 }
0x101e   :  { %v2556_v46 = vpop.eup %2555 }
0x101f   :  { %v1339_v26 = vsel %vm250_vm3, %v2556_v46, 0.0 }
0x1020   :  { %1340 = vadd.xlane.f32.xlu1 %v1339_v26 }
0x1031   :  { %1396 = vrot.lane.b32.xlu1 %v2899_v18, %s2591_s19 }
0x1032   :  { %1348 = vrot.lane.b32.xlu0 %v2895_v13, %s2591_s19 }
0x10a5   :  { %v1338_v47 = vpop.xlane.xlu0 %1337 }
0x10a6   :  { %2557 = vrcp.f32 %v1338_v47 }
0x10a9   :  { %v1349_v10 = vpop.permute.xlu0 %1348  ;;  %v1341_v48 = vpop.xlane.xlu1 %1340 }
0x10aa   :  { %v1354_v49 = vsel %vm280_vm4, %v1349_v10, 0  ;;  %2559 = vrcp.f32 %v1341_v48 }
0x10ab   :  { %2374 = vmatpush3.bf16.msra.mxu0 %v1354_v49 }
0x10ac   :  { %2385 = vmatprep.subr.bf16.mxu0 %v2585_v0 }
0x10ad   :  { %v1397_v50 = vpop.permute.xlu1 %1396 }
0x10ae   :  { %v1402_v51 = vsel %vm280_vm4, %v1397_v50, 0 }
0x10af   :  { %2380 = vmatpush3.bf16.msra.mxu1 %v1402_v51  ;;  %v1546_v51 = vrot.slane %v2996_v27, %v2825_v14 }
0x10b0   :  { %2393 = vmatprep.subr.bf16.mxu1 %v2585_v0 }
0x10b3   :  { %v2558_v18 = vpop.eup %2557 }
0x10b4   :  { %v1344_v52 = vmul.f32 %v2558_v18, %v2554_v44  ;;  %v2494_v44 = vld [vmem:[%s3147_s5 + $0x10] sm:$0xff]  }
0x10b6   :  { %v1346_v53 = vpack.c.bf16 %v1344_v52, %v1344_v52 }
0x10b7   :  { %v2560_v13 = vpop.eup %2559 }
0x10b8   :  { %2376 = vmatmul.mubr.msk.bf16.vlgmr.msra.gmra.mxu0 %vm250_vm3, %v1346_v53  ;;  %v1345_v55 = vmul.f32 %v2560_v13, %v2556_v46  ;;  %v1552_v13 = vrot.slane %v2996_v27, %v704_v42  ;;  %v2497_v42 = vld [vmem:[%s3148_s6 + $0x28] sm:$0xff]  }
0x10b9   :  { %2389 = vmatprep.mubr.msk.bf16.mxu0 %vm2586_vm0, %v2585_v0  ;;  %2386 = vmatpush3.bf16.msra.mxu0 %v2491_v57 }
0x10ba   :  { %v1347_v56 = vpack.c.bf16 %v1345_v55, %v1345_v55  ;;  %2387 = vmatprep.subr.bf16.mxu0 %v2585_v0 }
0x10bc   :  { %2382 = vmatmul.mubr.msk.bf16.vlgmr.msra.gmra.mxu1 %vm250_vm3, %v1347_v56 }
0x10bd   :  { %2397 = vmatprep.mubr.msk.bf16.mxu1 %vm2586_vm0, %v2585_v0  ;;  %2388 = vmatpush3.bf16.msra.mxu0 %v2492_v59 }
0x10be   :  { %2401 = vmatprep.subr.bf16.mxu0 %v2585_v0 }
0x1178   :  { %v1390_v60 = vpop.f32.mrf.mxu0 }
0x117a   :  { %v2377_v61 = vpop.f32.mrf.mxu0 }
0x117b   :  { %v2496_v61 = vld [vmem:[%s3148_s6 + $0x30] sm:$0xff]  }
0x117c   :  { %v1393_v62 = vpop.f32.mrf.mxu0  ;;  %v1438_v1 = vpop.f32.mrf.mxu1 }
0x117d   :  { %v2474_v63 = vpack.i.bf16 %v1438_v1, %v1390_v60  ;;  %v2495_v60 = vld [vmem:[%s3148_s6 + $0x38] sm:$0xff]   ;;  %v2498_v62 = vld [vmem:[%s3148_s6 + $0x20] sm:$0xff]  }
0x117e   :  { %v2378_v5 = vpop.f32.mrf.mxu0  ;;  %v2383_v11 = vpop.f32.mrf.mxu1  ;;  %v2120_v1 = vld [vmem:[%s3149_s8 + $0x1] ss:$0 sm:$0xff] }
0x117f   :  { %2475 = vrot.lane.b32.xlu1 %v2474_v63, %s2592_s24 }
0x1180   :  { %v1441_v12 = vpop.f32.mrf.mxu1 }
0x1182   :  { %v2384_v15 = vpop.f32.mrf.mxu1 }
0x11f1   :  { %v2476_v16 = vpop.permute.xlu1 %2475 }
0x11f2   :  { %v2478_v19 = vunpack.i.h.bf16 %v2476_v16  ;;  %v2477_v21 = vunpack.i.l.bf16 %v2476_v16 }
0x11f4   :  { %v1453_v22 = vsel %vm138_vm2, %v2955_v17, %v2478_v19  ;;  %v1452_v23 = vsel %vm138_vm2, %v2953_v9, %v2477_v21 }
0x11f5   :  { %v1454_v24 = vpack.c.bf16 %v1453_v22, %v1452_v23 }
0x11f7   :  { %2390 = vmatmul.mubr.msk.bf16.vlgmr.msra.gmra.mxu0 %vm88_vm1, %v1454_v24 }
0x11f8   :  { %2409 = vmatprep.mubr.msk.bf16.mxu0 %vm2586_vm0, %v2585_v0  ;;  %2402 = vmatpush3.bf16.msra.mxu0 %v2495_v60 }
0x11f9   :  { %2403 = vmatprep.subr.bf16.mxu0 %v2585_v0 }
0x11fc   :  { %2404 = vmatpush3.bf16.msra.mxu0 %v2496_v61 }
0x11fd   :  { %2405 = vmatprep.subr.bf16.mxu0 %v2585_v0 }
0x1200   :  { %2406 = vmatpush3.bf16.msra.mxu0 %v2497_v42 }
0x1201   :  { %2407 = vmatprep.subr.bf16.mxu0 %v2585_v0 }
0x1204   :  { %2408 = vmatpush3.bf16.msra.mxu0 %v2498_v62 }
0x1205   :  { %2441 = vmatprep.subr.bf16.mxu0 %v2585_v0 }
0x12b7   :  { %v1508_v29 = vpop.f32.mrf.mxu0 }
0x12b8   :  { %v1509_v3 = vadd.f32 %v1508_v29, %v1458_v28 }
0x12b9   :  { %v2391_v17 = vpop.f32.mrf.mxu0 }
0x12ba   :  { %v1515_v30 = vadd.f32 %v1509_v3, %v2883_v2 }
0x12bb   :  { %v1511_v9 = vpop.f32.mrf.mxu0 }
0x12bc   :  { %v1512_v31 = vadd.f32 %v1511_v9, %v1458_v28  ;;  %v1517_v4 = vsel %vm88_vm1, %v1515_v30, 0.0 }
0x12bd   :  { %1518 = vadd.xlane.f32.xlu0 %v1517_v4  ;;  %v2392_v32 = vpop.f32.mrf.mxu0 }
0x12be   :  { %v1516_v33 = vadd.f32 %v1512_v31, %v2885_v6  ;;  %v2493_v6 = vld [vmem:[%s3147_s5 + $0x18] sm:$0xff]  }
0x12bf   :  { %2394 = vmatpush3.bf16.msra.mxu1 %v2493_v6 }
0x12c0   :  { %v1520_v34 = vsel %vm88_vm1, %v1516_v33, 0.0  ;;  %2395 = vmatprep.subr.bf16.mxu1 %v2585_v0 }
0x12c1   :  { %1521 = vadd.xlane.f32.xlu1 %v1520_v34 }
0x12c3   :  { %2396 = vmatpush3.bf16.msra.mxu1 %v2494_v44 }
0x12c4   :  { %2413 = vmatprep.subr.bf16.mxu1 %v2585_v0 }
0x1346   :  { %v1519_v35 = vpop.xlane.xlu0 %1518 }
0x1347   :  { %v1523_v36 = vmul.f32 0.03125, %v1519_v35 }
0x1349   :  { %v1525_v37 = vsub.f32 %v1515_v30, %v1523_v36 }
0x134a   :  { %v1522_v38 = vpop.xlane.xlu1 %1521 }
0x134b   :  { %v1524_v39 = vmul.f32 0.03125, %v1522_v38  ;;  %v1527_v40 = vmul.f32 %v1525_v37, %v1525_v37  ;;  %v1640_v38 = vrot.slane %v2996_v27, %v2859_v25 }
0x134d   :  { %v1526_v41 = vsub.f32 %v1516_v33, %v1524_v39  ;;  %v1529_v2 = vsel %vm88_vm1, %v1527_v40, 0.0 }
0x134e   :  { %1530 = vadd.xlane.f32.xlu0 %v1529_v2 }
0x134f   :  { %v1528_v20 = vmul.f32 %v1526_v41, %v1526_v41 }
0x1351   :  { %v1532_v43 = vsel %vm88_vm1, %v1528_v20, 0.0 }
0x1352   :  { %1533 = vadd.xlane.f32.xlu0 %v1532_v43 }
0x13d7   :  { %v1531_v45 = vpop.xlane.xlu0 %1530 }
0x13d8   :  { %v1535_v46 = vmul.f32 0.03125, %v1531_v45 }
0x13da   :  { %v1537_v26 = vadd.f32 1e-12, %v1535_v46 }
0x13db   :  { %v1534_v47 = vpop.xlane.xlu0 %1533 }
0x13dc   :  { %2561 = vrsqrt.f32 %v1537_v26  ;;  %v1536_v10 = vmul.f32 0.03125, %v1534_v47 }
0x13de   :  { %v1538_v48 = vadd.f32 1e-12, %v1536_v10 }
0x13e0   :  { %2563 = vrsqrt.f32 %v1538_v48 }
0x13e9   :  { %v2562_v49 = vpop.eup %2561 }
0x13ea   :  { %v1541_v50 = vmul.f32 %v2562_v49, %v1525_v37 }
0x13ec   :  { %v1547_v53 = vmul.f32 %v1546_v51, %v1541_v50 }
0x13ed   :  { %v2564_v18 = vpop.eup %2563 }
0x13ee   :  { %v1542_v52 = vmul.f32 %v2564_v18, %v1526_v41  ;;  %v1553_v56 = vadd.f32 %v1552_v13, %v1547_v53 }
0x13f0   :  { %v1548_v55 = vmul.f32 %v1546_v51, %v1542_v52 }
0x13f2   :  { %v1554_v57 = vadd.f32 %v1552_v13, %v1548_v55  ;;  %v2499_v13 = vld [vmem:[%s3150_s9 + $0x8] sm:$0xff]   ;;  %v2500_v55 = vld [vmem:[%s3150_s9] sm:$0xff]  }
0x13f4   :  { %v1555_v59 = vpack.c.bf16 %v1554_v57, %v1553_v56 }
0x13f6   :  { %2398 = vmatmul.mubr.msk.bf16.vlgmr.msra.gmra.mxu1 %vm88_vm1, %v1555_v59 }
0x13f7   :  { %2417 = vmatprep.mubr.msk.bf16.mxu1 %vm2586_vm0, %v2585_v0  ;;  %2414 = vmatpush3.bf16.msra.mxu1 %v2499_v13 }
0x13f8   :  { %2415 = vmatprep.subr.bf16.mxu1 %v2585_v0 }
0x13fb   :  { %2416 = vmatpush3.bf16.msra.mxu1 %v2500_v55 }
0x13fc   :  { %2421 = vmatprep.subr.bf16.mxu1 %v2585_v0 }
0x14b6   :  { %v1611_v63 = vpop.f32.mrf.mxu1 }
0x14b7   :  { %v1612_v5 = vadd.f32 %v2120_v1, %v1611_v63  ;;  %v1740_v63 = vrot.slane %v2996_v27, %v893_v54  ;;  %v2502_v54 = vld [vmem:[%s3151_s10 + $0x30] sm:$0xff]  }
0x14b8   :  { %v2399_v11 = vpop.f32.mrf.mxu1 }
0x14b9   :  { %v1620_v12 = vmul.f32 0.044715, %v1612_v5  ;;  %v1618_v32 = vmul.f32 0.5, %v1612_v5 }
0x14ba   :  { %v1614_v15 = vpop.f32.mrf.mxu1 }
0x14bb   :  { %v1622_v16 = vmul.f32 %v1620_v12, %v1612_v5  ;;  %v1615_v19 = vadd.f32 %v2120_v1, %v1614_v15  ;;  %v1746_v15 = vrot.slane %v2996_v27, %v899_v58  ;;  %v2504_v58 = vld [vmem:[%s3151_s10 + $0x20] sm:$0xff]   ;;  %v2505_v27 = vld [vmem:[%s3151_s10 + $0x18] sm:$0xff]  }
0x14bc   :  { %v2400_v21 = vpop.f32.mrf.mxu1 }
0x14bd   :  { %v1624_v22 = vmul.f32 %v1622_v16, %v1612_v5  ;;  %v1621_v23 = vmul.f32 0.044715, %v1615_v19  ;;  %v1619_v33 = vmul.f32 0.5, %v1615_v19 }
0x14bf   :  { %v1626_v24 = vadd.f32 %v1624_v22, %v1612_v5  ;;  %v1623_v28 = vmul.f32 %v1621_v23, %v1615_v19  ;;  %v2501_v22 = vld [vmem:[%s3151_s10 + $0x38] sm:$0xff]  }
0x14c1   :  { %v1628_v29 = vmul.f32 0.7978846, %v1626_v24  ;;  %v1625_v3 = vmul.f32 %v1623_v28, %v1615_v19  ;;  %v2506_v24 = vld [vmem:[%s3151_s10 + $0x10] sm:$0xff]   ;;  %v2507_v28 = vld [vmem:[%s3151_s10 + $0x8] sm:$0xff]  }
0x14c3   :  { %2565 = vtanh.f32 %v1628_v29  ;;  %v1627_v17 = vadd.f32 %v1625_v3, %v1615_v19  ;;  %v2508_v29 = vld [vmem:[%s3151_s10] sm:$0xff]   ;;  %v2509_v3 = vld [vmem:[%s3151_s10 + $0x78] sm:$0xff]  }
0x14c5   :  { %v1629_v30 = vmul.f32 0.7978846, %v1627_v17  ;;  %v2510_v17 = vld [vmem:[%s3151_s10 + $0x70] sm:$0xff]  }
0x14c7   :  { %2567 = vtanh.f32 %v1629_v30  ;;  %v2511_v30 = vld [vmem:[%s3151_s10 + $0x68] sm:$0xff]  }
0x14d0   :  { %v2566_v9 = vpop.eup %2565 }
0x14d1   :  { %v1632_v31 = vadd.f32 1.0, %v2566_v9  ;;  %v2512_v9 = vld [vmem:[%s3151_s10 + $0x60] sm:$0xff]  }
0x14d3   :  { %v1634_v35 = vmul.f32 %v1632_v31, %v1618_v32  ;;  %v2513_v31 = vld [vmem:[%s3151_s10 + $0x58] sm:$0xff]   ;;  %v1749_v32 = vld [vmem:[%s3152_s11] sm:$0x7] }
0x14d4   :  { %v2568_v4 = vpop.eup %2567 }
0x14d5   :  { %v1633_v34 = vadd.f32 1.0, %v2568_v4  ;;  %v2514_v4 = vld [vmem:[%s3151_s10 + $0x50] sm:$0xff]  }
0x14d7   :  { %v1635_v36 = vmul.f32 %v1633_v34, %v1619_v33  ;;  %v1758_v33 = vrot.slane %v1749_v32, %v2801_v8  ;;  %v2516_v8 = vld [vmem:[%s3151_s10 + $0x40] sm:$0xff]  }
0x14d9   :  { %v1636_v37 = vpack.c.bf16 %v1635_v36, %v1634_v35 }
0x14db   :  { %2410 = vmatmul.mubr.msk.bf16.vlgmr.msra.gmra.mxu0 %vm818_vm5, %v1636_v37 }
0x14dc   :  { %2457 = vmatprep.mubr.msk.bf16.mxu0 %vm2586_vm0, %v2585_v0  ;;  %2442 = vmatpush3.bf16.msra.mxu0 %v2509_v3 }
0x14dd   :  { %2443 = vmatprep.subr.bf16.mxu0 %v2585_v0 }
0x14e0   :  { %2444 = vmatpush3.bf16.msra.mxu0 %v2510_v17 }
0x14e1   :  { %2445 = vmatprep.subr.bf16.mxu0 %v2585_v0 }
0x14e4   :  { %2446 = vmatpush3.bf16.msra.mxu0 %v2511_v30 }
0x14e5   :  { %2447 = vmatprep.subr.bf16.mxu0 %v2585_v0 }
0x14e8   :  { %2448 = vmatpush3.bf16.msra.mxu0 %v2512_v9 }
0x14e9   :  { %2449 = vmatprep.subr.bf16.mxu0 %v2585_v0 }
0x14ec   :  { %2450 = vmatpush3.bf16.msra.mxu0 %v2513_v31 }
0x14ed   :  { %2451 = vmatprep.subr.bf16.mxu0 %v2585_v0 }
0x14f0   :  { %2452 = vmatpush3.bf16.msra.mxu0 %v2514_v4 }
0x14f1   :  { %2453 = vmatprep.subr.bf16.mxu0 %v2585_v0 }
0x159b   :  { %v1702_v39 = vpop.f32.mrf.mxu0 }
0x159c   :  { %v1703_v40 = vadd.f32 %v1702_v39, %v1640_v38 }
0x159d   :  { %v2411_v41 = vpop.f32.mrf.mxu0 }
0x159e   :  { %v1709_v2 = vadd.f32 %v1703_v40, %v1553_v56 }
0x159f   :  { %v1705_v20 = vpop.f32.mrf.mxu0 }
0x15a0   :  { %v1706_v43 = vadd.f32 %v1705_v20, %v1640_v38  ;;  %v1711_v6 = vsel %vm88_vm1, %v1709_v2, 0.0  ;;  %v2515_v20 = vld [vmem:[%s3151_s10 + $0x48] sm:$0xff]  }
0x15a1   :  { %1712 = vadd.xlane.f32.xlu1 %v1711_v6  ;;  %v2412_v44 = vpop.f32.mrf.mxu0  ;;  %2454 = vmatpush3.bf16.msra.mxu0 %v2515_v20  ;;  %v1837_v6 = vrot.slane %v1749_v32, %v2859_v25 }
0x15a2   :  { %v1710_v45 = vadd.f32 %v1706_v43, %v1554_v57  ;;  %2455 = vmatprep.subr.bf16.mxu0 %v2585_v0 }
0x15a4   :  { %v1714_v46 = vsel %vm88_vm1, %v1710_v45, 0.0 }
0x15a5   :  { %1715 = vadd.xlane.f32.xlu0 %v1714_v46  ;;  %2456 = vmatpush3.bf16.msra.mxu0 %v2516_v8 }
0x162a   :  { %v1713_v26 = vpop.xlane.xlu1 %1712 }
0x162b   :  { %v1717_v47 = vmul.f32 0.03125, %v1713_v26 }
0x162d   :  { %v1719_v10 = vsub.f32 %v1709_v2, %v1717_v47 }
0x162e   :  { %v1716_v48 = vpop.xlane.xlu0 %1715 }
0x162f   :  { %v1718_v49 = vmul.f32 0.03125, %v1716_v48  ;;  %v1721_v50 = vmul.f32 %v1719_v10, %v1719_v10  ;;  %v1948_v48 = vrot.slane %v1749_v32, %v2825_v14 }
0x1631   :  { %v1720_v51 = vsub.f32 %v1710_v45, %v1718_v49  ;;  %v1723_v18 = vsel %vm88_vm1, %v1721_v50, 0.0 }
0x1632   :  { %1724 = vadd.xlane.f32.xlu1 %v1723_v18 }
0x1633   :  { %v1722_v52 = vmul.f32 %v1720_v51, %v1720_v51 }
0x1635   :  { %v1726_v53 = vsel %vm88_vm1, %v1722_v52, 0.0 }
0x1636   :  { %1727 = vadd.xlane.f32.xlu0 %v1726_v53 }
0x16bb   :  { %v1725_v56 = vpop.xlane.xlu1 %1724 }
0x16bc   :  { %v1729_v57 = vmul.f32 0.03125, %v1725_v56 }
0x16be   :  { %v1731_v59 = vadd.f32 1e-12, %v1729_v57 }
0x16bf   :  { %v1728_v60 = vpop.xlane.xlu0 %1727 }
0x16c0   :  { %2569 = vrsqrt.f32 %v1731_v59  ;;  %v1730_v61 = vmul.f32 0.03125, %v1728_v60 }
0x16c2   :  { %v1732_v42 = vadd.f32 1e-12, %v1730_v61 }
0x16c4   :  { %2571 = vrsqrt.f32 %v1732_v42 }
0x16cd   :  { %v2570_v62 = vpop.eup %2569 }
0x16ce   :  { %v1735_v1 = vmul.f32 %v2570_v62, %v1719_v10 }
0x16d0   :  { %v1741_v12 = vmul.f32 %v1740_v63, %v1735_v1 }
0x16d1   :  { %v2572_v5 = vpop.eup %2571 }
0x16d2   :  { %v1736_v11 = vmul.f32 %v2572_v5, %v1720_v51  ;;  %v1747_v19 = vadd.f32 %v1746_v15, %v1741_v12 }
0x16d4   :  { %v1742_v16 = vmul.f32 %v1740_v63, %v1736_v11 }
0x16d6   :  { %v1748_v21 = vadd.f32 %v1746_v15, %v1742_v16 }
0x16d8   :  { %v1750_v23 = vpack.c.bf16 %v1748_v21, %v1747_v19 }
0x16da   :  { %2418 = vmatmul.mubr.msk.bf16.vlgmr.msra.gmra.mxu1 %vm88_vm1, %v1750_v23 }
0x16db   :  { %2422 = vmatpush3.bf16.msra.mxu1 %v2501_v22  ;;  %2437 = vmatprep.mubr.msk.bf16.mxu1 %vm2586_vm0, %v2585_v0 }
0x16dc   :  { %2423 = vmatprep.subr.bf16.mxu1 %v2585_v0 }
0x16df   :  { %2424 = vmatpush3.bf16.msra.mxu1 %v2502_v54 }
0x16e0   :  { %2425 = vmatprep.subr.bf16.mxu1 %v2585_v0 }
0x16e3   :  { %2426 = vmatpush3.bf16.msra.mxu1 %v2503_v7 }
0x16e4   :  { %2427 = vmatprep.subr.bf16.mxu1 %v2585_v0 }
0x16e7   :  { %2428 = vmatpush3.bf16.msra.mxu1 %v2504_v58 }
0x16e8   :  { %2429 = vmatprep.subr.bf16.mxu1 %v2585_v0 }
0x16eb   :  { %2430 = vmatpush3.bf16.msra.mxu1 %v2505_v27 }
0x16ec   :  { %2431 = vmatprep.subr.bf16.mxu1 %v2585_v0 }
0x16ef   :  { %2432 = vmatpush3.bf16.msra.mxu1 %v2506_v24 }
0x16f0   :  { %2433 = vmatprep.subr.bf16.mxu1 %v2585_v0 }
0x16f3   :  { %2434 = vmatpush3.bf16.msra.mxu1 %v2507_v28 }
0x16f4   :  { %2435 = vmatprep.subr.bf16.mxu1 %v2585_v0 }
0x16f7   :  { %2436 = vmatpush3.bf16.msra.mxu1 %v2508_v29 }
0x179a   :  { %v1808_v34 = vpop.f32.mrf.mxu1 }
0x179b   :  { %v1809_v35 = vadd.f32 %v1808_v34, %v1758_v33 }
0x179c   :  { %v2419_v36 = vpop.f32.mrf.mxu1 }
0x179d   :  { %2573 = vtanh.f32 %v1809_v35 }
0x179e   :  { %v1811_v37 = vpop.f32.mrf.mxu1 }
0x179f   :  { %v1812_v38 = vadd.f32 %v1811_v37, %v1758_v33 }
0x17a0   :  { %v2420_v39 = vpop.f32.mrf.mxu1 }
0x17a1   :  { %2575 = vtanh.f32 %v1812_v38 }
0x17aa   :  { %v2574_v40 = vpop.eup %2573 }
0x17ae   :  { %v2576_v41 = vpop.eup %2575 }
0x17af   :  { %v1817_v2 = vpack.c.bf16 %v2576_v41, %v2574_v40 }
0x17b1   :  { %2438 = vmatmul.mubr.bf16.vlgmr.msra.gmra.mxu1 %v1817_v2 }
0x1871   :  { %v1920_v43 = vpop.f32.mrf.mxu1 }
0x1872   :  { %v1921_v46 = vadd.f32 %v1920_v43, %v1837_v6 }
0x1873   :  { %v2439_v44 = vpop.f32.mrf.mxu1 }
0x1875   :  { %v1923_v45 = vpop.f32.mrf.mxu1 }
0x1876   :  { %v1924_v26 = vadd.f32 %v1923_v45, %v1837_v6 }
0x1877   :  { %v2440_v47 = vpop.f32.mrf.mxu1 }
0x1878   :  { %v1927_v10 = vpack.c.bf16 %v1924_v26, %v1921_v46 }
0x187a   :  { %2458 = vmatmul.mubr.bf16.vlgmr.msra.gmra.mxu0 %v1927_v10 }
0x193a   :  { %v2031_v49 = vpop.f32.mrf.mxu0 }
0x193b   :  { %v2032_v50 = vadd.f32 %v2031_v49, %v1948_v48 }
0x193c   :  { %v2459_v0 = vpop.f32.mrf.mxu0 }
0x193d   :  { %v2038_v51 = vsub.f32 0.0, %v2032_v50 }
0x193e   :  { %v2034_v18 = vpop.f32.mrf.mxu0 }
0x193f   :  { %v2040_v52 = vmul.f32 1.442695, %v2038_v51  ;;  %v2035_v53 = vadd.f32 %v2034_v18, %v1948_v48 }
0x1940   :  { %v2460_v13 = vpop.f32.mrf.mxu0 }
0x1941   :  { %2577 = vpow2.f32 %v2040_v52  ;;  %v2039_v55 = vsub.f32 0.0, %v2035_v53 }
0x1943   :  { %v2042_v25 = vmul.f32 1.442695, %v2039_v55 }
0x1945   :  { %2579 = vpow2.f32 %v2042_v25 }
0x194e   :  { %v2578_v56 = vpop.eup %2577 }
0x194f   :  { %v2044_v57 = vadd.f32 1.0, %v2578_v56 }
0x1951   :  { %2581 = vrcp.f32 %v2044_v57 }
0x1952   :  { %v2580_v59 = vpop.eup %2579 }
0x1953   :  { %v2045_v60 = vadd.f32 1.0, %v2580_v59 }
0x1955   :  { %2583 = vrcp.f32 %v2045_v60 }
0x195e   :  { %v2582_v61 = vpop.eup %2581 }
0x195f   :  { %2050 = vst [vmem:[%s3153_s12] sm:$0xff] %v2582_v61 }
0x1962   :  { %v2584_v14 = vpop.eup %2583 }
0x1963   :  { %2051 = vst [vmem:[%s3153_s12 + $0x8] sm:$0xff] %v2584_v14 }

</bundles_post_ra>
